<compile_context>
chip_gen: v7x
topology: tpu7x:2x2x1
jax: 0.10.0
libtpu: 0.0.40
codegen_flags: <defaults>
</compile_context>

<pallas_src>
import numpy as np
import jax
import jax.numpy as jnp
from jax import lax
from jax.experimental import pallas as pl
from jax.experimental.pallas import tpu as pltpu


# -----------------------------------------------------------------------------
# Multi-layer LSTM, layer-major, zero initial state.
# Input  : x_flat  (S1*Bp, 2D)  bf16, time-major rows grouped by timestep.
# Output : out     (S1*Bp, Hp)  f32, lane-dense (Hp = H padded to 128);
#                               columns H..Hp are exactly zero.
# Scratch: gates   (S1*Bp, 4H)  f32 (per-layer precomputed input projection).
# PyTorch gate order (i, f, g, o) and equations reproduced exactly.
# -----------------------------------------------------------------------------
def make_lstm_kernel(num_layers, seq_len, batch, hidden, hidden_pad):
    H = hidden
    Hp = hidden_pad
    Bp = batch

    def kernel(*args):
        x_ref = args[0]
        w_refs = args[1:1 + 3 * num_layers]
        out_ref = args[1 + 3 * num_layers]
        gates_ref = args[2 + 3 * num_layers]

        # Zero once so the padded hidden columns (H..Hp) stay exactly zero; the
        # recurrence only ever writes columns 0..H.
        out_ref[...] = jnp.zeros_like(out_ref)

        for l in range(num_layers):
            w_ih = w_refs[3 * l][...]        # (2D or Hp, 4H) bf16
            w_hh = w_refs[3 * l + 1][...]    # (H, 4H)        bf16
            b = w_refs[3 * l + 2][...]       # (1, 4H)        f32 (= b_ih + b_hh)

            if l == 0:
                xin = x_ref[...]                               # (S1*Bp, 2D) bf16
            else:
                xin = out_ref[...].astype(jnp.bfloat16)        # (S1*Bp, Hp)

            # One big MXU matmul for the whole sequence; bias folded in here
            # (hoisted out of the serial recurrence).
            gates_ref[...] = (
                jnp.dot(xin, w_ih, preferred_element_type=jnp.float32) + b)

            def step(t, carry, w_hh=w_hh):
                h, c = carry                                   # (Bp, H) f32
                row = pl.multiple_of(t * Bp, Bp)
                g = gates_ref[pl.ds(row, Bp), :] + jnp.dot(
                    h.astype(jnp.bfloat16), w_hh,
                    preferred_element_type=jnp.float32)        # (Bp, 4H) f32
                # Two full-width EUP passes instead of four narrow masked ones.
                sig = jax.nn.sigmoid(g)
                th = jnp.tanh(g)
                i_g = sig[:, 0:H]
                f_g = sig[:, H:2 * H]
                o_g = sig[:, 3 * H:4 * H]
                g_g = th[:, 2 * H:3 * H]
                c_new = f_g * c + i_g * g_g
                h_new = o_g * jnp.tanh(c_new)
                out_ref[pl.ds(row, Bp), pl.ds(0, H)] = h_new
                return h_new, c_new

            h0 = jnp.zeros((Bp, H), jnp.float32)
            c0 = jnp.zeros((Bp, H), jnp.float32)
            # Latency-bound serial recurrence: full unroll for cross-step
            # scheduling visibility.
            lax.fori_loop(0, seq_len, step, (h0, c0), unroll=True)

    return kernel


def lstm_forward(x_flat, lstm_weights, seq_len, batch, hidden, hidden_pad):
    num_layers = len(lstm_weights)
    flat = []
    for (w_ih_T, w_hh_T, b) in lstm_weights:
        flat += [w_ih_T, w_hh_T, b]
    vmem = pl.BlockSpec(memory_space=pltpu.MemorySpace.VMEM)
    return pl.pallas_call(
        make_lstm_kernel(num_layers, seq_len, batch, hidden, hidden_pad),
        out_shape=jax.ShapeDtypeStruct((seq_len * batch, hidden_pad), jnp.float32),
        in_specs=[vmem] * (1 + len(flat)),
        out_specs=vmem,
        scratch_shapes=[pltpu.VMEM((seq_len * batch, 4 * hidden), jnp.float32)],
        compiler_params=pltpu.CompilerParams(vmem_limit_bytes=48 * 1024 * 1024),
    )(x_flat, *flat)


# -----------------------------------------------------------------------------
# pre_linear MLP: Linear -> LeakyReLU(0.01) -> Linear -> LeakyReLU -> Linear
# Row-tiled pipelined grid kernel. All intermediate widths and the output are
# lane-padded to 128 so every activation / store is lane-dense. The first
# Linear is split into an event branch and an lstm branch so the (T, D+H)
# concat never materializes in HBM.
# -----------------------------------------------------------------------------
def mlp_kernel(xe_ref, xl_ref, w1e_ref, w1l_ref, b1_ref,
               w2_ref, b2_ref, w3_ref, b3_ref, o_ref):
    slope = jnp.float32(0.01)  # nn.LeakyReLU default negative_slope
    h = (jnp.dot(xe_ref[...], w1e_ref[...], preferred_element_type=jnp.float32)
         + jnp.dot(xl_ref[...], w1l_ref[...], preferred_element_type=jnp.float32)
         + b1_ref[...])
    h = jnp.where(h > 0, h, slope * h)
    h = jnp.dot(h.astype(jnp.bfloat16), w2_ref[...],
                preferred_element_type=jnp.float32) + b2_ref[...]
    h = jnp.where(h > 0, h, slope * h)
    o_ref[...] = jnp.dot(h.astype(jnp.bfloat16), w3_ref[...],
                         preferred_element_type=jnp.float32) + b3_ref[...]


def mlp_forward(x_ev, x_ls, mlp_weights, output_size):
    (w1e, w1l, b1), (w2, b2), (w3, b3) = mlp_weights   # all lane-padded to 128
    T, D = x_ev.shape
    Hp = x_ls.shape[1]
    OUTp = w3.shape[1]

    T8 = max(8, ((T + 7) // 8) * 8)
    if T8 >= 2048:
        tile_t = 1024
    elif T8 >= 1024:
        tile_t = 512
    elif T8 >= 512:
        tile_t = 256
    else:
        # Small T: pick a tile that yields >= 2 grid steps (keeps v7x's second
        # TensorCore busy via the "parallel" axis).
        tile_t = max(8, (((T8 // 2) + 7) // 8) * 8)
    Tp = ((T + tile_t - 1) // tile_t) * tile_t
    x_ev = jnp.pad(x_ev, ((0, Tp - T), (0, 0)))
    x_ls = jnp.pad(x_ls, ((0, Tp - T), (0, 0)))

    out = pl.pallas_call(
        mlp_kernel,
        out_shape=jax.ShapeDtypeStruct((Tp, OUTp), jnp.float32),
        grid=(Tp // tile_t,),
        in_specs=[
            pl.BlockSpec((tile_t, D), lambda i: (i, 0)),
            pl.BlockSpec((tile_t, Hp), lambda i: (i, 0)),
            pl.BlockSpec(w1e.shape, lambda i: (0, 0)),
            pl.BlockSpec(w1l.shape, lambda i: (0, 0)),
            pl.BlockSpec(b1.shape, lambda i: (0, 0)),
            pl.BlockSpec(w2.shape, lambda i: (0, 0)),
            pl.BlockSpec(b2.shape, lambda i: (0, 0)),
            pl.BlockSpec(w3.shape, lambda i: (0, 0)),
            pl.BlockSpec(b3.shape, lambda i: (0, 0)),
        ],
        out_specs=pl.BlockSpec((tile_t, OUTp), lambda i: (i, 0)),
        compiler_params=pltpu.CompilerParams(
            dimension_semantics=("parallel",),
            vmem_limit_bytes=32 * 1024 * 1024),
    )(x_ev, x_ls, w1e, w1l, b1, w2, b2, w3, b3)
    return out[:T, :output_size]


# -----------------------------------------------------------------------------
# Host-side replica of pack_padded_sequence(batch_first=True,
# enforce_sorted=False) index bookkeeping, vectorized (PyTorch also moves
# valid_len to CPU). Row order: for each t, sorted batches with length > t.
# -----------------------------------------------------------------------------
def packed_order(valid_len):
    vl = np.asarray(valid_len).astype(np.int64)
    order = np.argsort(-vl, kind="stable")
    max_len = int(vl.max())
    sorted_len = vl[order]
    mask = sorted_len[None, :] > np.arange(max_len)[:, None]   # (max_len, B)
    time_idx, pos = np.nonzero(mask)                           # row-major = time-major
    return order[pos].astype(np.int32), time_idx.astype(np.int32)


# -----------------------------------------------------------------------------
# Model wrapper with deterministic parameter initialization.
# -----------------------------------------------------------------------------
class ScatterVisitTimePredictorPallas:
    def __init__(self, key, num_events, num_time_slots, input_size,
                 lstm_hidden_size, fc_hidden_size, output_size, num_layers):
        self.num_time_slots = num_time_slots
        self.input_size = input_size
        self.hidden_size = lstm_hidden_size
        self.output_size = output_size
        self.num_layers = num_layers

        H = lstm_hidden_size
        Hp = ((H + 127) // 128) * 128          # lane-dense hidden width
        self.hidden_pad = Hp

        def nrm(k, shape, scale=0.1):
            return scale * jax.random.normal(k, shape, dtype=jnp.float32)

        def pad2(w, r, c):
            out = jnp.zeros((r, c), jnp.float32)
            return out.at[:w.shape[0], :w.shape[1]].set(w)

        keys = iter(jax.random.split(key, 64))

        # embed_layer: simple event embedding table (synthetic stand-in).
        self.event_table = nrm(next(keys), (num_events, input_size))
        self.time_table = nrm(next(keys), (num_time_slots, input_size))
        self.sos_token = nrm(next(keys), (2 * input_size,))

        # LSTM weights: pre-transposed for x @ W; bias = b_ih + b_hh combined.
        # MXU operands stored in bf16, biases stay f32. Layer>0 input weights
        # are zero-row-padded to Hp (the padded hidden lanes are exactly zero).
        self.lstm_weights = []
        for l in range(num_layers):
            in_dim = 2 * input_size if l == 0 else H
            w_ih = nrm(next(keys), (in_dim, 4 * H))
            if l > 0:
                w_ih = pad2(w_ih, Hp, 4 * H)
            w_hh = nrm(next(keys), (H, 4 * H))
            bias = nrm(next(keys), (1, 4 * H))
            self.lstm_weights.append(
                (w_ih.astype(jnp.bfloat16), w_hh.astype(jnp.bfloat16), bias))

        # pre_linear MLP (weights transposed: (in, out)); every width padded to
        # a multiple of 128 (zeros) so all activations / stores are lane-dense.
        # w1 is split into the event branch (D rows) and the lstm branch
        # (Hp rows, rows >= H zero) so the pre-MLP concat is not needed.
        FC = fc_hidden_size
        FC4 = fc_hidden_size // 4
        FCp = ((FC + 127) // 128) * 128
        FC4p = ((FC4 + 127) // 128) * 128
        OUTp = ((output_size + 127) // 128) * 128

        w1e = nrm(next(keys), (input_size, FC))
        w1l = nrm(next(keys), (H, FC))
        b1 = nrm(next(keys), (1, FC))
        w2 = nrm(next(keys), (FC, FC4))
        b2 = nrm(next(keys), (1, FC4))
        w3 = nrm(next(keys), (FC4, output_size))
        b3 = nrm(next(keys), (1, output_size))

        self.mlp_weights = [
            (pad2(w1e, input_size, FCp).astype(jnp.bfloat16),
             pad2(w1l, Hp, FCp).astype(jnp.bfloat16),
             pad2(b1, 1, FCp)),
            (pad2(w2, FCp, FC4p).astype(jnp.bfloat16), pad2(b2, 1, FC4p)),
            (pad2(w3, FC4p, OUTp).astype(jnp.bfloat16), pad2(b3, 1, OUTp)),
        ]

    def __call__(self, input_time, input_events, valid_len):
        """
        input_time:   (B, S) float32 in [0, 1)
        input_events: (B, S) int32
        valid_len:    (B,) host-side int array (valid_len[b] <= S)
        returns:      (sum(valid_len), output_size) float32 (packed order)
        """
        B, S = input_events.shape
        D = self.input_size
        H = self.hidden_size
        Hp = self.hidden_pad
        S1 = S + 1
        Bp = ((B + 7) // 8) * 8            # pad batch to the f32 sublane (8)

        # embeddings built directly TIME-MAJOR (avoids HBM transpose of floats)
        ev_tm = input_events.T                                        # (S, B)
        event_emb_tm = jnp.take(self.event_table, ev_tm, axis=0)      # (S, B, D)
        t_idx = jnp.clip(
            jnp.floor(input_time.T * self.num_time_slots).astype(jnp.int32),
            0, self.num_time_slots - 1)
        time_emb_tm = jnp.take(self.time_table, t_idx, axis=0)        # (S, B, D)

        body = jnp.concatenate([event_emb_tm, time_emb_tm], axis=-1)  # (S, B, 2D)
        sos = jnp.broadcast_to(self.sos_token.reshape(1, 1, 2 * D), (1, B, 2 * D))
        x_tm = jnp.concatenate([sos, body], axis=0)                   # (S1, B, 2D)
        if Bp != B:
            x_tm = jnp.pad(x_tm, ((0, 0), (0, Bp - B), (0, 0)))
        x_flat = x_tm.reshape(S1 * Bp, 2 * D).astype(jnp.bfloat16)

        # LSTM kernel (layer-major, flat time-major rows, lane-dense output)
        lstm_out = lstm_forward(x_flat, self.lstm_weights, S1, Bp, H, Hp)  # (S1*Bp, Hp)

        # pack_padded_sequence data ordering (host, vectorized) + gathers.
        # Row t*Bp+b of lstm_out is the hidden state after consuming
        # lstm_input[b, t] (sos at t=0), i.e. the state *before* event t —
        # matching PyTorch's time_encoder_out.data pairing with event t.
        batch_idx, time_idx = packed_order(valid_len)
        packed_event = event_emb_tm[time_idx, batch_idx]               # (T, D)
        packed_lstm = lstm_out[time_idx * Bp + batch_idx]              # (T, Hp)

        # pre_linear MLP kernel (row-tiled grid, lane-dense everywhere,
        # concat fused into the split first Linear)
        return mlp_forward(packed_event.astype(jnp.bfloat16),
                           packed_lstm.astype(jnp.bfloat16),
                           self.mlp_weights, self.output_size)


if __name__ == "__main__":
    key = jax.random.PRNGKey(0)
    k_time, k_events, k_params = jax.random.split(key, 3)

    # small shapes consistent with the module
    B, S = 4, 8
    num_events = 20
    num_time_slots = 24
    input_size = 16
    lstm_hidden_size = 32
    fc_hidden_size = 32
    output_size = 1
    num_layers = 2

    input_time = jax.random.uniform(k_time, (B, S), dtype=jnp.float32)
    input_events = jax.random.randint(k_events, (B, S), 0, num_events, dtype=jnp.int32)
    valid_len = np.array([8, 5, 3, 6], dtype=np.int32)  # host-side, like valid_len.cpu()

    model = ScatterVisitTimePredictorPallas(
        k_params, num_events, num_time_slots, input_size,
        lstm_hidden_size, fc_hidden_size, output_size, num_layers)

    time_pre = model(input_time, input_events, valid_len)
    time_pre = jax.block_until_ready(time_pre)

    assert time_pre.shape == (int(valid_len.sum()), output_size), time_pre.shape
    assert bool(jnp.all(jnp.isfinite(time_pre)))
    print("KERNEL_OK")
</pallas_src>

<mosaic_0001>
module attributes {stable_mosaic.version = 11 : i64} {
  func.func @kernel(%arg0: memref<72x32xbf16, #tpu.memory_space<vmem>>, %arg1: memref<32x128xbf16, #tpu.memory_space<vmem>>, %arg2: memref<32x128xbf16, #tpu.memory_space<vmem>>, %arg3: memref<1x128xf32, #tpu.memory_space<vmem>>, %arg4: memref<128x128xbf16, #tpu.memory_space<vmem>>, %arg5: memref<32x128xbf16, #tpu.memory_space<vmem>>, %arg6: memref<1x128xf32, #tpu.memory_space<vmem>>, %arg7: memref<72x128xf32, #tpu.memory_space<vmem>>, %arg8: memref<72x128xf32, #tpu.memory_space<vmem>>) attributes {dimension_semantics = [], scalar_prefetch = 0 : i64, scratch_operands = 1 : i64, tpu.core_type = #tpu.core_type<tc>} {
    %cst = arith.constant 0.000000e+00 : f32
    %0 = vector.broadcast %cst : f32 to vector<72x128xf32>
    %c0 = arith.constant 0 : index
    %c0_0 = arith.constant 0 : index
    %1 = vector.load %arg7[%c0, %c0_0] : memref<72x128xf32, #tpu.memory_space<vmem>>, vector<72x128xf32>
    tpu.vector_store %arg7[%c0, %c0_0], %0 {strides = array<i32>} : memref<72x128xf32, #tpu.memory_space<vmem>>, vector<72x128xf32>,
    %c0_1 = arith.constant 0 : index
    %c0_2 = arith.constant 0 : index
    %2 = vector.load %arg1[%c0_1, %c0_2] : memref<32x128xbf16, #tpu.memory_space<vmem>>, vector<32x128xbf16>
    %c0_3 = arith.constant 0 : index
    %c0_4 = arith.constant 0 : index
    %3 = vector.load %arg2[%c0_3, %c0_4] : memref<32x128xbf16, #tpu.memory_space<vmem>>, vector<32x128xbf16>
    %c0_5 = arith.constant 0 : index
    %c0_6 = arith.constant 0 : index
    %4 = vector.load %arg3[%c0_5, %c0_6] : memref<1x128xf32, #tpu.memory_space<vmem>>, vector<1x128xf32>
    %c0_7 = arith.constant 0 : index
    %c0_8 = arith.constant 0 : index
    %5 = vector.load %arg0[%c0_7, %c0_8] : memref<72x32xbf16, #tpu.memory_space<vmem>>, vector<72x32xbf16>
    %cst_9 = arith.constant dense<0.000000e+00> : vector<72x128xf32>
    %6 = tpu.matmul %5, %2, %cst_9 {dimension_numbers = #tpu.dot_dimension_numbers<[1], [0], [0], [1], [0, 0, 1, 1], [], []>} : vector<72x32xbf16>, vector<32x128xbf16>, vector<72x128xf32> -> vector<72x128xf32>
    %7 = vector.broadcast %4 : vector<1x128xf32> to vector<72x128xf32>
    %8 = arith.addf %6, %7 : vector<72x128xf32>
    %c0_10 = arith.constant 0 : index
    %c0_11 = arith.constant 0 : index
    %9 = vector.load %arg8[%c0_10, %c0_11] : memref<72x128xf32, #tpu.memory_space<vmem>>, vector<72x128xf32>
    tpu.vector_store %arg8[%c0_10, %c0_11], %8 {strides = array<i32>} : memref<72x128xf32, #tpu.memory_space<vmem>>, vector<72x128xf32>,
    %cst_12 = arith.constant 0.000000e+00 : f32
    %10 = vector.broadcast %cst_12 : f32 to vector<8x32xf32>
    %cst_13 = arith.constant 0.000000e+00 : f32
    %11 = vector.broadcast %cst_13 : f32 to vector<8x32xf32>
    %c0_i32 = arith.constant 0 : i32
    %c8_i32 = arith.constant 8 : i32
    %12 = arith.muli %c0_i32, %c8_i32 : i32
    %13 = tpu.assume_multiple %12, 8 : i32
    %14 = arith.index_cast %13 : i32 to index
    %c0_14 = arith.constant 0 : index
    %15 = vector.load %arg8[%14, %c0_14] : memref<72x128xf32, #tpu.memory_space<vmem>>, vector<8x128xf32>
    %16 = arith.truncf %10 : vector<8x32xf32> to vector<8x32xbf16>
    %cst_15 = arith.constant dense<0.000000e+00> : vector<8x128xf32>
    %17 = tpu.matmul %16, %3, %cst_15 {dimension_numbers = #tpu.dot_dimension_numbers<[1], [0], [0], [1], [0, 0, 1, 1], [], []>} : vector<8x32xbf16>, vector<32x128xbf16>, vector<8x128xf32> -> vector<8x128xf32>
    %18 = arith.addf %15, %17 : vector<8x128xf32>
    %19 = arith.negf %18 : vector<8x128xf32>
    %20 = math.exp %19 : vector<8x128xf32>
    %cst_16 = arith.constant 1.000000e+00 : f32
    %21 = vector.broadcast %cst_16 : f32 to vector<8x128xf32>
    %22 = arith.addf %21, %20 : vector<8x128xf32>
    %23 = arith.divf %21, %22 : vector<8x128xf32>
    %24 = math.tanh %18 : vector<8x128xf32>
    %25 = vector.extract_strided_slice %23 {offsets = [0, 0], sizes = [8, 32], strides = [1, 1]} : vector<8x128xf32> to vector<8x32xf32>
    %26 = vector.extract_strided_slice %23 {offsets = [0, 32], sizes = [8, 32], strides = [1, 1]} : vector<8x128xf32> to vector<8x32xf32>
    %27 = vector.extract_strided_slice %23 {offsets = [0, 96], sizes = [8, 32], strides = [1, 1]} : vector<8x128xf32> to vector<8x32xf32>
    %28 = vector.extract_strided_slice %24 {offsets = [0, 64], sizes = [8, 32], strides = [1, 1]} : vector<8x128xf32> to vector<8x32xf32>
    %29 = arith.mulf %26, %11 : vector<8x32xf32>
    %30 = arith.mulf %25, %28 : vector<8x32xf32>
    %31 = arith.addf %29, %30 : vector<8x32xf32>
    %32 = math.tanh %31 : vector<8x32xf32>
    %33 = arith.mulf %27, %32 : vector<8x32xf32>
    %34 = arith.index_cast %13 : i32 to index
    %c0_17 = arith.constant 0 : index
    %35 = vector.load %arg7[%34, %c0_17] : memref<72x128xf32, #tpu.memory_space<vmem>>, vector<8x32xf32>
    tpu.vector_store %arg7[%34, %c0_17], %33 {strides = array<i32>} : memref<72x128xf32, #tpu.memory_space<vmem>>, vector<8x32xf32>,
    %c1_i32 = arith.constant 1 : i32
    %c8_i32_18 = arith.constant 8 : i32
    %36 = arith.muli %c1_i32, %c8_i32_18 : i32
    %37 = tpu.assume_multiple %36, 8 : i32
    %38 = arith.index_cast %37 : i32 to index
    %c0_19 = arith.constant 0 : index
    %39 = vector.load %arg8[%38, %c0_19] : memref<72x128xf32, #tpu.memory_space<vmem>>, vector<8x128xf32>
    %40 = arith.truncf %33 : vector<8x32xf32> to vector<8x32xbf16>
    %cst_20 = arith.constant dense<0.000000e+00> : vector<8x128xf32>
    %41 = tpu.matmul %40, %3, %cst_20 {dimension_numbers = #tpu.dot_dimension_numbers<[1], [0], [0], [1], [0, 0, 1, 1], [], []>} : vector<8x32xbf16>, vector<32x128xbf16>, vector<8x128xf32> -> vector<8x128xf32>
    %42 = arith.addf %39, %41 : vector<8x128xf32>
    %43 = arith.negf %42 : vector<8x128xf32>
    %44 = math.exp %43 : vector<8x128xf32>
    %cst_21 = arith.constant 1.000000e+00 : f32
    %45 = vector.broadcast %cst_21 : f32 to vector<8x128xf32>
    %46 = arith.addf %45, %44 : vector<8x128xf32>
    %47 = arith.divf %45, %46 : vector<8x128xf32>
    %48 = math.tanh %42 : vector<8x128xf32>
    %49 = vector.extract_strided_slice %47 {offsets = [0, 0], sizes = [8, 32], strides = [1, 1]} : vector<8x128xf32> to vector<8x32xf32>
    %50 = vector.extract_strided_slice %47 {offsets = [0, 32], sizes = [8, 32], strides = [1, 1]} : vector<8x128xf32> to vector<8x32xf32>
    %51 = vector.extract_strided_slice %47 {offsets = [0, 96], sizes = [8, 32], strides = [1, 1]} : vector<8x128xf32> to vector<8x32xf32>
    %52 = vector.extract_strided_slice %48 {offsets = [0, 64], sizes = [8, 32], strides = [1, 1]} : vector<8x128xf32> to vector<8x32xf32>
    %53 = arith.mulf %50, %31 : vector<8x32xf32>
    %54 = arith.mulf %49, %52 : vector<8x32xf32>
    %55 = arith.addf %53, %54 : vector<8x32xf32>
    %56 = math.tanh %55 : vector<8x32xf32>
    %57 = arith.mulf %51, %56 : vector<8x32xf32>
    %58 = arith.index_cast %37 : i32 to index
    %c0_22 = arith.constant 0 : index
    %59 = vector.load %arg7[%58, %c0_22] : memref<72x128xf32, #tpu.memory_space<vmem>>, vector<8x32xf32>
    tpu.vector_store %arg7[%58, %c0_22], %57 {strides = array<i32>} : memref<72x128xf32, #tpu.memory_space<vmem>>, vector<8x32xf32>,
    %c2_i32 = arith.constant 2 : i32
    %c8_i32_23 = arith.constant 8 : i32
    %60 = arith.muli %c2_i32, %c8_i32_23 : i32
    %61 = tpu.assume_multiple %60, 8 : i32
    %62 = arith.index_cast %61 : i32 to index
    %c0_24 = arith.constant 0 : index
    %63 = vector.load %arg8[%62, %c0_24] : memref<72x128xf32, #tpu.memory_space<vmem>>, vector<8x128xf32>
    %64 = arith.truncf %57 : vector<8x32xf32> to vector<8x32xbf16>
    %cst_25 = arith.constant dense<0.000000e+00> : vector<8x128xf32>
    %65 = tpu.matmul %64, %3, %cst_25 {dimension_numbers = #tpu.dot_dimension_numbers<[1], [0], [0], [1], [0, 0, 1, 1], [], []>} : vector<8x32xbf16>, vector<32x128xbf16>, vector<8x128xf32> -> vector<8x128xf32>
    %66 = arith.addf %63, %65 : vector<8x128xf32>
    %67 = arith.negf %66 : vector<8x128xf32>
    %68 = math.exp %67 : vector<8x128xf32>
    %cst_26 = arith.constant 1.000000e+00 : f32
    %69 = vector.broadcast %cst_26 : f32 to vector<8x128xf32>
    %70 = arith.addf %69, %68 : vector<8x128xf32>
    %71 = arith.divf %69, %70 : vector<8x128xf32>
    %72 = math.tanh %66 : vector<8x128xf32>
    %73 = vector.extract_strided_slice %71 {offsets = [0, 0], sizes = [8, 32], strides = [1, 1]} : vector<8x128xf32> to vector<8x32xf32>
    %74 = vector.extract_strided_slice %71 {offsets = [0, 32], sizes = [8, 32], strides = [1, 1]} : vector<8x128xf32> to vector<8x32xf32>
    %75 = vector.extract_strided_slice %71 {offsets = [0, 96], sizes = [8, 32], strides = [1, 1]} : vector<8x128xf32> to vector<8x32xf32>
    %76 = vector.extract_strided_slice %72 {offsets = [0, 64], sizes = [8, 32], strides = [1, 1]} : vector<8x128xf32> to vector<8x32xf32>
    %77 = arith.mulf %74, %55 : vector<8x32xf32>
    %78 = arith.mulf %73, %76 : vector<8x32xf32>
    %79 = arith.addf %77, %78 : vector<8x32xf32>
    %80 = math.tanh %79 : vector<8x32xf32>
    %81 = arith.mulf %75, %80 : vector<8x32xf32>
    %82 = arith.index_cast %61 : i32 to index
    %c0_27 = arith.constant 0 : index
    %83 = vector.load %arg7[%82, %c0_27] : memref<72x128xf32, #tpu.memory_space<vmem>>, vector<8x32xf32>
    tpu.vector_store %arg7[%82, %c0_27], %81 {strides = array<i32>} : memref<72x128xf32, #tpu.memory_space<vmem>>, vector<8x32xf32>,
    %c3_i32 = arith.constant 3 : i32
    %c8_i32_28 = arith.constant 8 : i32
    %84 = arith.muli %c3_i32, %c8_i32_28 : i32
    %85 = tpu.assume_multiple %84, 8 : i32
    %86 = arith.index_cast %85 : i32 to index
    %c0_29 = arith.constant 0 : index
    %87 = vector.load %arg8[%86, %c0_29] : memref<72x128xf32, #tpu.memory_space<vmem>>, vector<8x128xf32>
    %88 = arith.truncf %81 : vector<8x32xf32> to vector<8x32xbf16>
    %cst_30 = arith.constant dense<0.000000e+00> : vector<8x128xf32>
    %89 = tpu.matmul %88, %3, %cst_30 {dimension_numbers = #tpu.dot_dimension_numbers<[1], [0], [0], [1], [0, 0, 1, 1], [], []>} : vector<8x32xbf16>, vector<32x128xbf16>, vector<8x128xf32> -> vector<8x128xf32>
    %90 = arith.addf %87, %89 : vector<8x128xf32>
    %91 = arith.negf %90 : vector<8x128xf32>
    %92 = math.exp %91 : vector<8x128xf32>
    %cst_31 = arith.constant 1.000000e+00 : f32
    %93 = vector.broadcast %cst_31 : f32 to vector<8x128xf32>
    %94 = arith.addf %93, %92 : vector<8x128xf32>
    %95 = arith.divf %93, %94 : vector<8x128xf32>
    %96 = math.tanh %90 : vector<8x128xf32>
    %97 = vector.extract_strided_slice %95 {offsets = [0, 0], sizes = [8, 32], strides = [1, 1]} : vector<8x128xf32> to vector<8x32xf32>
    %98 = vector.extract_strided_slice %95 {offsets = [0, 32], sizes = [8, 32], strides = [1, 1]} : vector<8x128xf32> to vector<8x32xf32>
    %99 = vector.extract_strided_slice %95 {offsets = [0, 96], sizes = [8, 32], strides = [1, 1]} : vector<8x128xf32> to vector<8x32xf32>
    %100 = vector.extract_strided_slice %96 {offsets = [0, 64], sizes = [8, 32], strides = [1, 1]} : vector<8x128xf32> to vector<8x32xf32>
    %101 = arith.mulf %98, %79 : vector<8x32xf32>
    %102 = arith.mulf %97, %100 : vector<8x32xf32>
    %103 = arith.addf %101, %102 : vector<8x32xf32>
    %104 = math.tanh %103 : vector<8x32xf32>
    %105 = arith.mulf %99, %104 : vector<8x32xf32>
    %106 = arith.index_cast %85 : i32 to index
    %c0_32 = arith.constant 0 : index
    %107 = vector.load %arg7[%106, %c0_32] : memref<72x128xf32, #tpu.memory_space<vmem>>, vector<8x32xf32>
    tpu.vector_store %arg7[%106, %c0_32], %105 {strides = array<i32>} : memref<72x128xf32, #tpu.memory_space<vmem>>, vector<8x32xf32>,
    %c4_i32 = arith.constant 4 : i32
    %c8_i32_33 = arith.constant 8 : i32
    %108 = arith.muli %c4_i32, %c8_i32_33 : i32
    %109 = tpu.assume_multiple %108, 8 : i32
    %110 = arith.index_cast %109 : i32 to index
    %c0_34 = arith.constant 0 : index
    %111 = vector.load %arg8[%110, %c0_34] : memref<72x128xf32, #tpu.memory_space<vmem>>, vector<8x128xf32>
    %112 = arith.truncf %105 : vector<8x32xf32> to vector<8x32xbf16>
    %cst_35 = arith.constant dense<0.000000e+00> : vector<8x128xf32>
    %113 = tpu.matmul %112, %3, %cst_35 {dimension_numbers = #tpu.dot_dimension_numbers<[1], [0], [0], [1], [0, 0, 1, 1], [], []>} : vector<8x32xbf16>, vector<32x128xbf16>, vector<8x128xf32> -> vector<8x128xf32>
    %114 = arith.addf %111, %113 : vector<8x128xf32>
    %115 = arith.negf %114 : vector<8x128xf32>
    %116 = math.exp %115 : vector<8x128xf32>
    %cst_36 = arith.constant 1.000000e+00 : f32
    %117 = vector.broadcast %cst_36 : f32 to vector<8x128xf32>
    %118 = arith.addf %117, %116 : vector<8x128xf32>
    %119 = arith.divf %117, %118 : vector<8x128xf32>
    %120 = math.tanh %114 : vector<8x128xf32>
    %121 = vector.extract_strided_slice %119 {offsets = [0, 0], sizes = [8, 32], strides = [1, 1]} : vector<8x128xf32> to vector<8x32xf32>
    %122 = vector.extract_strided_slice %119 {offsets = [0, 32], sizes = [8, 32], strides = [1, 1]} : vector<8x128xf32> to vector<8x32xf32>
    %123 = vector.extract_strided_slice %119 {offsets = [0, 96], sizes = [8, 32], strides = [1, 1]} : vector<8x128xf32> to vector<8x32xf32>
    %124 = vector.extract_strided_slice %120 {offsets = [0, 64], sizes = [8, 32], strides = [1, 1]} : vector<8x128xf32> to vector<8x32xf32>
    %125 = arith.mulf %122, %103 : vector<8x32xf32>
    %126 = arith.mulf %121, %124 : vector<8x32xf32>
    %127 = arith.addf %125, %126 : vector<8x32xf32>
    %128 = math.tanh %127 : vector<8x32xf32>
    %129 = arith.mulf %123, %128 : vector<8x32xf32>
    %130 = arith.index_cast %109 : i32 to index
    %c0_37 = arith.constant 0 : index
    %131 = vector.load %arg7[%130, %c0_37] : memref<72x128xf32, #tpu.memory_space<vmem>>, vector<8x32xf32>
    tpu.vector_store %arg7[%130, %c0_37], %129 {strides = array<i32>} : memref<72x128xf32, #tpu.memory_space<vmem>>, vector<8x32xf32>,
    %c5_i32 = arith.constant 5 : i32
    %c8_i32_38 = arith.constant 8 : i32
    %132 = arith.muli %c5_i32, %c8_i32_38 : i32
    %133 = tpu.assume_multiple %132, 8 : i32
    %134 = arith.index_cast %133 : i32 to index
    %c0_39 = arith.constant 0 : index
    %135 = vector.load %arg8[%134, %c0_39] : memref<72x128xf32, #tpu.memory_space<vmem>>, vector<8x128xf32>
    %136 = arith.truncf %129 : vector<8x32xf32> to vector<8x32xbf16>
    %cst_40 = arith.constant dense<0.000000e+00> : vector<8x128xf32>
    %137 = tpu.matmul %136, %3, %cst_40 {dimension_numbers = #tpu.dot_dimension_numbers<[1], [0], [0], [1], [0, 0, 1, 1], [], []>} : vector<8x32xbf16>, vector<32x128xbf16>, vector<8x128xf32> -> vector<8x128xf32>
    %138 = arith.addf %135, %137 : vector<8x128xf32>
    %139 = arith.negf %138 : vector<8x128xf32>
    %140 = math.exp %139 : vector<8x128xf32>
    %cst_41 = arith.constant 1.000000e+00 : f32
    %141 = vector.broadcast %cst_41 : f32 to vector<8x128xf32>
    %142 = arith.addf %141, %140 : vector<8x128xf32>
    %143 = arith.divf %141, %142 : vector<8x128xf32>
    %144 = math.tanh %138 : vector<8x128xf32>
    %145 = vector.extract_strided_slice %143 {offsets = [0, 0], sizes = [8, 32], strides = [1, 1]} : vector<8x128xf32> to vector<8x32xf32>
    %146 = vector.extract_strided_slice %143 {offsets = [0, 32], sizes = [8, 32], strides = [1, 1]} : vector<8x128xf32> to vector<8x32xf32>
    %147 = vector.extract_strided_slice %143 {offsets = [0, 96], sizes = [8, 32], strides = [1, 1]} : vector<8x128xf32> to vector<8x32xf32>
    %148 = vector.extract_strided_slice %144 {offsets = [0, 64], sizes = [8, 32], strides = [1, 1]} : vector<8x128xf32> to vector<8x32xf32>
    %149 = arith.mulf %146, %127 : vector<8x32xf32>
    %150 = arith.mulf %145, %148 : vector<8x32xf32>
    %151 = arith.addf %149, %150 : vector<8x32xf32>
    %152 = math.tanh %151 : vector<8x32xf32>
    %153 = arith.mulf %147, %152 : vector<8x32xf32>
    %154 = arith.index_cast %133 : i32 to index
    %c0_42 = arith.constant 0 : index
    %155 = vector.load %arg7[%154, %c0_42] : memref<72x128xf32, #tpu.memory_space<vmem>>, vector<8x32xf32>
    tpu.vector_store %arg7[%154, %c0_42], %153 {strides = array<i32>} : memref<72x128xf32, #tpu.memory_space<vmem>>, vector<8x32xf32>,
    %c6_i32 = arith.constant 6 : i32
    %c8_i32_43 = arith.constant 8 : i32
    %156 = arith.muli %c6_i32, %c8_i32_43 : i32
    %157 = tpu.assume_multiple %156, 8 : i32
    %158 = arith.index_cast %157 : i32 to index
    %c0_44 = arith.constant 0 : index
    %159 = vector.load %arg8[%158, %c0_44] : memref<72x128xf32, #tpu.memory_space<vmem>>, vector<8x128xf32>
    %160 = arith.truncf %153 : vector<8x32xf32> to vector<8x32xbf16>
    %cst_45 = arith.constant dense<0.000000e+00> : vector<8x128xf32>
    %161 = tpu.matmul %160, %3, %cst_45 {dimension_numbers = #tpu.dot_dimension_numbers<[1], [0], [0], [1], [0, 0, 1, 1], [], []>} : vector<8x32xbf16>, vector<32x128xbf16>, vector<8x128xf32> -> vector<8x128xf32>
    %162 = arith.addf %159, %161 : vector<8x128xf32>
    %163 = arith.negf %162 : vector<8x128xf32>
    %164 = math.exp %163 : vector<8x128xf32>
    %cst_46 = arith.constant 1.000000e+00 : f32
    %165 = vector.broadcast %cst_46 : f32 to vector<8x128xf32>
    %166 = arith.addf %165, %164 : vector<8x128xf32>
    %167 = arith.divf %165, %166 : vector<8x128xf32>
    %168 = math.tanh %162 : vector<8x128xf32>
    %169 = vector.extract_strided_slice %167 {offsets = [0, 0], sizes = [8, 32], strides = [1, 1]} : vector<8x128xf32> to vector<8x32xf32>
    %170 = vector.extract_strided_slice %167 {offsets = [0, 32], sizes = [8, 32], strides = [1, 1]} : vector<8x128xf32> to vector<8x32xf32>
    %171 = vector.extract_strided_slice %167 {offsets = [0, 96], sizes = [8, 32], strides = [1, 1]} : vector<8x128xf32> to vector<8x32xf32>
    %172 = vector.extract_strided_slice %168 {offsets = [0, 64], sizes = [8, 32], strides = [1, 1]} : vector<8x128xf32> to vector<8x32xf32>
    %173 = arith.mulf %170, %151 : vector<8x32xf32>
    %174 = arith.mulf %169, %172 : vector<8x32xf32>
    %175 = arith.addf %173, %174 : vector<8x32xf32>
    %176 = math.tanh %175 : vector<8x32xf32>
    %177 = arith.mulf %171, %176 : vector<8x32xf32>
    %178 = arith.index_cast %157 : i32 to index
    %c0_47 = arith.constant 0 : index
    %179 = vector.load %arg7[%178, %c0_47] : memref<72x128xf32, #tpu.memory_space<vmem>>, vector<8x32xf32>
    tpu.vector_store %arg7[%178, %c0_47], %177 {strides = array<i32>} : memref<72x128xf32, #tpu.memory_space<vmem>>, vector<8x32xf32>,
    %c7_i32 = arith.constant 7 : i32
    %c8_i32_48 = arith.constant 8 : i32
    %180 = arith.muli %c7_i32, %c8_i32_48 : i32
    %181 = tpu.assume_multiple %180, 8 : i32
    %182 = arith.index_cast %181 : i32 to index
    %c0_49 = arith.constant 0 : index
    %183 = vector.load %arg8[%182, %c0_49] : memref<72x128xf32, #tpu.memory_space<vmem>>, vector<8x128xf32>
    %184 = arith.truncf %177 : vector<8x32xf32> to vector<8x32xbf16>
    %cst_50 = arith.constant dense<0.000000e+00> : vector<8x128xf32>
    %185 = tpu.matmul %184, %3, %cst_50 {dimension_numbers = #tpu.dot_dimension_numbers<[1], [0], [0], [1], [0, 0, 1, 1], [], []>} : vector<8x32xbf16>, vector<32x128xbf16>, vector<8x128xf32> -> vector<8x128xf32>
    %186 = arith.addf %183, %185 : vector<8x128xf32>
    %187 = arith.negf %186 : vector<8x128xf32>
    %188 = math.exp %187 : vector<8x128xf32>
    %cst_51 = arith.constant 1.000000e+00 : f32
    %189 = vector.broadcast %cst_51 : f32 to vector<8x128xf32>
    %190 = arith.addf %189, %188 : vector<8x128xf32>
    %191 = arith.divf %189, %190 : vector<8x128xf32>
    %192 = math.tanh %186 : vector<8x128xf32>
    %193 = vector.extract_strided_slice %191 {offsets = [0, 0], sizes = [8, 32], strides = [1, 1]} : vector<8x128xf32> to vector<8x32xf32>
    %194 = vector.extract_strided_slice %191 {offsets = [0, 32], sizes = [8, 32], strides = [1, 1]} : vector<8x128xf32> to vector<8x32xf32>
    %195 = vector.extract_strided_slice %191 {offsets = [0, 96], sizes = [8, 32], strides = [1, 1]} : vector<8x128xf32> to vector<8x32xf32>
    %196 = vector.extract_strided_slice %192 {offsets = [0, 64], sizes = [8, 32], strides = [1, 1]} : vector<8x128xf32> to vector<8x32xf32>
    %197 = arith.mulf %194, %175 : vector<8x32xf32>
    %198 = arith.mulf %193, %196 : vector<8x32xf32>
    %199 = arith.addf %197, %198 : vector<8x32xf32>
    %200 = math.tanh %199 : vector<8x32xf32>
    %201 = arith.mulf %195, %200 : vector<8x32xf32>
    %202 = arith.index_cast %181 : i32 to index
    %c0_52 = arith.constant 0 : index
    %203 = vector.load %arg7[%202, %c0_52] : memref<72x128xf32, #tpu.memory_space<vmem>>, vector<8x32xf32>
    tpu.vector_store %arg7[%202, %c0_52], %201 {strides = array<i32>} : memref<72x128xf32, #tpu.memory_space<vmem>>, vector<8x32xf32>,
    %c8_i32_53 = arith.constant 8 : i32
    %c8_i32_54 = arith.constant 8 : i32
    %204 = arith.muli %c8_i32_53, %c8_i32_54 : i32
    %205 = tpu.assume_multiple %204, 8 : i32
    %206 = arith.index_cast %205 : i32 to index
    %c0_55 = arith.constant 0 : index
    %207 = vector.load %arg8[%206, %c0_55] : memref<72x128xf32, #tpu.memory_space<vmem>>, vector<8x128xf32>
    %208 = arith.truncf %201 : vector<8x32xf32> to vector<8x32xbf16>
    %cst_56 = arith.constant dense<0.000000e+00> : vector<8x128xf32>
    %209 = tpu.matmul %208, %3, %cst_56 {dimension_numbers = #tpu.dot_dimension_numbers<[1], [0], [0], [1], [0, 0, 1, 1], [], []>} : vector<8x32xbf16>, vector<32x128xbf16>, vector<8x128xf32> -> vector<8x128xf32>
    %210 = arith.addf %207, %209 : vector<8x128xf32>
    %211 = arith.negf %210 : vector<8x128xf32>
    %212 = math.exp %211 : vector<8x128xf32>
    %cst_57 = arith.constant 1.000000e+00 : f32
    %213 = vector.broadcast %cst_57 : f32 to vector<8x128xf32>
    %214 = arith.addf %213, %212 : vector<8x128xf32>
    %215 = arith.divf %213, %214 : vector<8x128xf32>
    %216 = math.tanh %210 : vector<8x128xf32>
    %217 = vector.extract_strided_slice %215 {offsets = [0, 0], sizes = [8, 32], strides = [1, 1]} : vector<8x128xf32> to vector<8x32xf32>
    %218 = vector.extract_strided_slice %215 {offsets = [0, 32], sizes = [8, 32], strides = [1, 1]} : vector<8x128xf32> to vector<8x32xf32>
    %219 = vector.extract_strided_slice %215 {offsets = [0, 96], sizes = [8, 32], strides = [1, 1]} : vector<8x128xf32> to vector<8x32xf32>
    %220 = vector.extract_strided_slice %216 {offsets = [0, 64], sizes = [8, 32], strides = [1, 1]} : vector<8x128xf32> to vector<8x32xf32>
    %221 = arith.mulf %218, %199 : vector<8x32xf32>
    %222 = arith.mulf %217, %220 : vector<8x32xf32>
    %223 = arith.addf %221, %222 : vector<8x32xf32>
    %224 = math.tanh %223 : vector<8x32xf32>
    %225 = arith.mulf %219, %224 : vector<8x32xf32>
    %226 = arith.index_cast %205 : i32 to index
    %c0_58 = arith.constant 0 : index
    %227 = vector.load %arg7[%226, %c0_58] : memref<72x128xf32, #tpu.memory_space<vmem>>, vector<8x32xf32>
    tpu.vector_store %arg7[%226, %c0_58], %225 {strides = array<i32>} : memref<72x128xf32, #tpu.memory_space<vmem>>, vector<8x32xf32>,
    %c9_i32 = arith.constant 9 : i32
    %c0_59 = arith.constant 0 : index
    %c0_60 = arith.constant 0 : index
    %228 = vector.load %arg4[%c0_59, %c0_60] : memref<128x128xbf16, #tpu.memory_space<vmem>>, vector<128x128xbf16>
    %c0_61 = arith.constant 0 : index
    %c0_62 = arith.constant 0 : index
    %229 = vector.load %arg5[%c0_61, %c0_62] : memref<32x128xbf16, #tpu.memory_space<vmem>>, vector<32x128xbf16>
    %c0_63 = arith.constant 0 : index
    %c0_64 = arith.constant 0 : index
    %230 = vector.load %arg6[%c0_63, %c0_64] : memref<1x128xf32, #tpu.memory_space<vmem>>, vector<1x128xf32>
    %c0_65 = arith.constant 0 : index
    %c0_66 = arith.constant 0 : index
    %231 = vector.load %arg7[%c0_65, %c0_66] : memref<72x128xf32, #tpu.memory_space<vmem>>, vector<72x128xf32>
    %232 = arith.truncf %231 : vector<72x128xf32> to vector<72x128xbf16>
    %cst_67 = arith.constant dense<0.000000e+00> : vector<72x128xf32>
    %233 = tpu.matmul %232, %228, %cst_67 {dimension_numbers = #tpu.dot_dimension_numbers<[1], [0], [0], [1], [0, 0, 1, 1], [], []>} : vector<72x128xbf16>, vector<128x128xbf16>, vector<72x128xf32> -> vector<72x128xf32>
    %234 = vector.broadcast %230 : vector<1x128xf32> to vector<72x128xf32>
    %235 = arith.addf %233, %234 : vector<72x128xf32>
    %c0_68 = arith.constant 0 : index
    %c0_69 = arith.constant 0 : index
    %236 = vector.load %arg8[%c0_68, %c0_69] : memref<72x128xf32, #tpu.memory_space<vmem>>, vector<72x128xf32>
    tpu.vector_store %arg8[%c0_68, %c0_69], %235 {strides = array<i32>} : memref<72x128xf32, #tpu.memory_space<vmem>>, vector<72x128xf32>,
    %cst_70 = arith.constant 0.000000e+00 : f32
    %237 = vector.broadcast %cst_70 : f32 to vector<8x32xf32>
    %cst_71 = arith.constant 0.000000e+00 : f32
    %238 = vector.broadcast %cst_71 : f32 to vector<8x32xf32>
    %c0_i32_72 = arith.constant 0 : i32
    %c8_i32_73 = arith.constant 8 : i32
    %239 = arith.muli %c0_i32_72, %c8_i32_73 : i32
    %240 = tpu.assume_multiple %239, 8 : i32
    %241 = arith.index_cast %240 : i32 to index
    %c0_74 = arith.constant 0 : index
    %242 = vector.load %arg8[%241, %c0_74] : memref<72x128xf32, #tpu.memory_space<vmem>>, vector<8x128xf32>
    %243 = arith.truncf %237 : vector<8x32xf32> to vector<8x32xbf16>
    %cst_75 = arith.constant dense<0.000000e+00> : vector<8x128xf32>
    %244 = tpu.matmul %243, %229, %cst_75 {dimension_numbers = #tpu.dot_dimension_numbers<[1], [0], [0], [1], [0, 0, 1, 1], [], []>} : vector<8x32xbf16>, vector<32x128xbf16>, vector<8x128xf32> -> vector<8x128xf32>
    %245 = arith.addf %242, %244 : vector<8x128xf32>
    %246 = arith.negf %245 : vector<8x128xf32>
    %247 = math.exp %246 : vector<8x128xf32>
    %cst_76 = arith.constant 1.000000e+00 : f32
    %248 = vector.broadcast %cst_76 : f32 to vector<8x128xf32>
    %249 = arith.addf %248, %247 : vector<8x128xf32>
    %250 = arith.divf %248, %249 : vector<8x128xf32>
    %251 = math.tanh %245 : vector<8x128xf32>
    %252 = vector.extract_strided_slice %250 {offsets = [0, 0], sizes = [8, 32], strides = [1, 1]} : vector<8x128xf32> to vector<8x32xf32>
    %253 = vector.extract_strided_slice %250 {offsets = [0, 32], sizes = [8, 32], strides = [1, 1]} : vector<8x128xf32> to vector<8x32xf32>
    %254 = vector.extract_strided_slice %250 {offsets = [0, 96], sizes = [8, 32], strides = [1, 1]} : vector<8x128xf32> to vector<8x32xf32>
    %255 = vector.extract_strided_slice %251 {offsets = [0, 64], sizes = [8, 32], strides = [1, 1]} : vector<8x128xf32> to vector<8x32xf32>
    %256 = arith.mulf %253, %238 : vector<8x32xf32>
    %257 = arith.mulf %252, %255 : vector<8x32xf32>
    %258 = arith.addf %256, %257 : vector<8x32xf32>
    %259 = math.tanh %258 : vector<8x32xf32>
    %260 = arith.mulf %254, %259 : vector<8x32xf32>
    %261 = arith.index_cast %240 : i32 to index
    %c0_77 = arith.constant 0 : index
    %262 = vector.load %arg7[%261, %c0_77] : memref<72x128xf32, #tpu.memory_space<vmem>>, vector<8x32xf32>
    tpu.vector_store %arg7[%261, %c0_77], %260 {strides = array<i32>} : memref<72x128xf32, #tpu.memory_space<vmem>>, vector<8x32xf32>,
    %c1_i32_78 = arith.constant 1 : i32
    %c8_i32_79 = arith.constant 8 : i32
    %263 = arith.muli %c1_i32_78, %c8_i32_79 : i32
    %264 = tpu.assume_multiple %263, 8 : i32
    %265 = arith.index_cast %264 : i32 to index
    %c0_80 = arith.constant 0 : index
    %266 = vector.load %arg8[%265, %c0_80] : memref<72x128xf32, #tpu.memory_space<vmem>>, vector<8x128xf32>
    %267 = arith.truncf %260 : vector<8x32xf32> to vector<8x32xbf16>
    %cst_81 = arith.constant dense<0.000000e+00> : vector<8x128xf32>
    %268 = tpu.matmul %267, %229, %cst_81 {dimension_numbers = #tpu.dot_dimension_numbers<[1], [0], [0], [1], [0, 0, 1, 1], [], []>} : vector<8x32xbf16>, vector<32x128xbf16>, vector<8x128xf32> -> vector<8x128xf32>
    %269 = arith.addf %266, %268 : vector<8x128xf32>
    %270 = arith.negf %269 : vector<8x128xf32>
    %271 = math.exp %270 : vector<8x128xf32>
    %cst_82 = arith.constant 1.000000e+00 : f32
    %272 = vector.broadcast %cst_82 : f32 to vector<8x128xf32>
    %273 = arith.addf %272, %271 : vector<8x128xf32>
    %274 = arith.divf %272, %273 : vector<8x128xf32>
    %275 = math.tanh %269 : vector<8x128xf32>
    %276 = vector.extract_strided_slice %274 {offsets = [0, 0], sizes = [8, 32], strides = [1, 1]} : vector<8x128xf32> to vector<8x32xf32>
    %277 = vector.extract_strided_slice %274 {offsets = [0, 32], sizes = [8, 32], strides = [1, 1]} : vector<8x128xf32> to vector<8x32xf32>
    %278 = vector.extract_strided_slice %274 {offsets = [0, 96], sizes = [8, 32], strides = [1, 1]} : vector<8x128xf32> to vector<8x32xf32>
    %279 = vector.extract_strided_slice %275 {offsets = [0, 64], sizes = [8, 32], strides = [1, 1]} : vector<8x128xf32> to vector<8x32xf32>
    %280 = arith.mulf %277, %258 : vector<8x32xf32>
    %281 = arith.mulf %276, %279 : vector<8x32xf32>
    %282 = arith.addf %280, %281 : vector<8x32xf32>
    %283 = math.tanh %282 : vector<8x32xf32>
    %284 = arith.mulf %278, %283 : vector<8x32xf32>
    %285 = arith.index_cast %264 : i32 to index
    %c0_83 = arith.constant 0 : index
    %286 = vector.load %arg7[%285, %c0_83] : memref<72x128xf32, #tpu.memory_space<vmem>>, vector<8x32xf32>
    tpu.vector_store %arg7[%285, %c0_83], %284 {strides = array<i32>} : memref<72x128xf32, #tpu.memory_space<vmem>>, vector<8x32xf32>,
    %c2_i32_84 = arith.constant 2 : i32
    %c8_i32_85 = arith.constant 8 : i32
    %287 = arith.muli %c2_i32_84, %c8_i32_85 : i32
    %288 = tpu.assume_multiple %287, 8 : i32
    %289 = arith.index_cast %288 : i32 to index
    %c0_86 = arith.constant 0 : index
    %290 = vector.load %arg8[%289, %c0_86] : memref<72x128xf32, #tpu.memory_space<vmem>>, vector<8x128xf32>
    %291 = arith.truncf %284 : vector<8x32xf32> to vector<8x32xbf16>
    %cst_87 = arith.constant dense<0.000000e+00> : vector<8x128xf32>
    %292 = tpu.matmul %291, %229, %cst_87 {dimension_numbers = #tpu.dot_dimension_numbers<[1], [0], [0], [1], [0, 0, 1, 1], [], []>} : vector<8x32xbf16>, vector<32x128xbf16>, vector<8x128xf32> -> vector<8x128xf32>
    %293 = arith.addf %290, %292 : vector<8x128xf32>
    %294 = arith.negf %293 : vector<8x128xf32>
    %295 = math.exp %294 : vector<8x128xf32>
    %cst_88 = arith.constant 1.000000e+00 : f32
    %296 = vector.broadcast %cst_88 : f32 to vector<8x128xf32>
    %297 = arith.addf %296, %295 : vector<8x128xf32>
    %298 = arith.divf %296, %297 : vector<8x128xf32>
    %299 = math.tanh %293 : vector<8x128xf32>
    %300 = vector.extract_strided_slice %298 {offsets = [0, 0], sizes = [8, 32], strides = [1, 1]} : vector<8x128xf32> to vector<8x32xf32>
    %301 = vector.extract_strided_slice %298 {offsets = [0, 32], sizes = [8, 32], strides = [1, 1]} : vector<8x128xf32> to vector<8x32xf32>
    %302 = vector.extract_strided_slice %298 {offsets = [0, 96], sizes = [8, 32], strides = [1, 1]} : vector<8x128xf32> to vector<8x32xf32>
    %303 = vector.extract_strided_slice %299 {offsets = [0, 64], sizes = [8, 32], strides = [1, 1]} : vector<8x128xf32> to vector<8x32xf32>
    %304 = arith.mulf %301, %282 : vector<8x32xf32>
    %305 = arith.mulf %300, %303 : vector<8x32xf32>
    %306 = arith.addf %304, %305 : vector<8x32xf32>
    %307 = math.tanh %306 : vector<8x32xf32>
    %308 = arith.mulf %302, %307 : vector<8x32xf32>
    %309 = arith.index_cast %288 : i32 to index
    %c0_89 = arith.constant 0 : index
    %310 = vector.load %arg7[%309, %c0_89] : memref<72x128xf32, #tpu.memory_space<vmem>>, vector<8x32xf32>
    tpu.vector_store %arg7[%309, %c0_89], %308 {strides = array<i32>} : memref<72x128xf32, #tpu.memory_space<vmem>>, vector<8x32xf32>,
    %c3_i32_90 = arith.constant 3 : i32
    %c8_i32_91 = arith.constant 8 : i32
    %311 = arith.muli %c3_i32_90, %c8_i32_91 : i32
    %312 = tpu.assume_multiple %311, 8 : i32
    %313 = arith.index_cast %312 : i32 to index
    %c0_92 = arith.constant 0 : index
    %314 = vector.load %arg8[%313, %c0_92] : memref<72x128xf32, #tpu.memory_space<vmem>>, vector<8x128xf32>
    %315 = arith.truncf %308 : vector<8x32xf32> to vector<8x32xbf16>
    %cst_93 = arith.constant dense<0.000000e+00> : vector<8x128xf32>
    %316 = tpu.matmul %315, %229, %cst_93 {dimension_numbers = #tpu.dot_dimension_numbers<[1], [0], [0], [1], [0, 0, 1, 1], [], []>} : vector<8x32xbf16>, vector<32x128xbf16>, vector<8x128xf32> -> vector<8x128xf32>
    %317 = arith.addf %314, %316 : vector<8x128xf32>
    %318 = arith.negf %317 : vector<8x128xf32>
    %319 = math.exp %318 : vector<8x128xf32>
    %cst_94 = arith.constant 1.000000e+00 : f32
    %320 = vector.broadcast %cst_94 : f32 to vector<8x128xf32>
    %321 = arith.addf %320, %319 : vector<8x128xf32>
    %322 = arith.divf %320, %321 : vector<8x128xf32>
    %323 = math.tanh %317 : vector<8x128xf32>
    %324 = vector.extract_strided_slice %322 {offsets = [0, 0], sizes = [8, 32], strides = [1, 1]} : vector<8x128xf32> to vector<8x32xf32>
    %325 = vector.extract_strided_slice %322 {offsets = [0, 32], sizes = [8, 32], strides = [1, 1]} : vector<8x128xf32> to vector<8x32xf32>
    %326 = vector.extract_strided_slice %322 {offsets = [0, 96], sizes = [8, 32], strides = [1, 1]} : vector<8x128xf32> to vector<8x32xf32>
    %327 = vector.extract_strided_slice %323 {offsets = [0, 64], sizes = [8, 32], strides = [1, 1]} : vector<8x128xf32> to vector<8x32xf32>
    %328 = arith.mulf %325, %306 : vector<8x32xf32>
    %329 = arith.mulf %324, %327 : vector<8x32xf32>
    %330 = arith.addf %328, %329 : vector<8x32xf32>
    %331 = math.tanh %330 : vector<8x32xf32>
    %332 = arith.mulf %326, %331 : vector<8x32xf32>
    %333 = arith.index_cast %312 : i32 to index
    %c0_95 = arith.constant 0 : index
    %334 = vector.load %arg7[%333, %c0_95] : memref<72x128xf32, #tpu.memory_space<vmem>>, vector<8x32xf32>
    tpu.vector_store %arg7[%333, %c0_95], %332 {strides = array<i32>} : memref<72x128xf32, #tpu.memory_space<vmem>>, vector<8x32xf32>,
    %c4_i32_96 = arith.constant 4 : i32
    %c8_i32_97 = arith.constant 8 : i32
    %335 = arith.muli %c4_i32_96, %c8_i32_97 : i32
    %336 = tpu.assume_multiple %335, 8 : i32
    %337 = arith.index_cast %336 : i32 to index
    %c0_98 = arith.constant 0 : index
    %338 = vector.load %arg8[%337, %c0_98] : memref<72x128xf32, #tpu.memory_space<vmem>>, vector<8x128xf32>
    %339 = arith.truncf %332 : vector<8x32xf32> to vector<8x32xbf16>
    %cst_99 = arith.constant dense<0.000000e+00> : vector<8x128xf32>
    %340 = tpu.matmul %339, %229, %cst_99 {dimension_numbers = #tpu.dot_dimension_numbers<[1], [0], [0], [1], [0, 0, 1, 1], [], []>} : vector<8x32xbf16>, vector<32x128xbf16>, vector<8x128xf32> -> vector<8x128xf32>
    %341 = arith.addf %338, %340 : vector<8x128xf32>
    %342 = arith.negf %341 : vector<8x128xf32>
    %343 = math.exp %342 : vector<8x128xf32>
    %cst_100 = arith.constant 1.000000e+00 : f32
    %344 = vector.broadcast %cst_100 : f32 to vector<8x128xf32>
    %345 = arith.addf %344, %343 : vector<8x128xf32>
    %346 = arith.divf %344, %345 : vector<8x128xf32>
    %347 = math.tanh %341 : vector<8x128xf32>
    %348 = vector.extract_strided_slice %346 {offsets = [0, 0], sizes = [8, 32], strides = [1, 1]} : vector<8x128xf32> to vector<8x32xf32>
    %349 = vector.extract_strided_slice %346 {offsets = [0, 32], sizes = [8, 32], strides = [1, 1]} : vector<8x128xf32> to vector<8x32xf32>
    %350 = vector.extract_strided_slice %346 {offsets = [0, 96], sizes = [8, 32], strides = [1, 1]} : vector<8x128xf32> to vector<8x32xf32>
    %351 = vector.extract_strided_slice %347 {offsets = [0, 64], sizes = [8, 32], strides = [1, 1]} : vector<8x128xf32> to vector<8x32xf32>
    %352 = arith.mulf %349, %330 : vector<8x32xf32>
    %353 = arith.mulf %348, %351 : vector<8x32xf32>
    %354 = arith.addf %352, %353 : vector<8x32xf32>
    %355 = math.tanh %354 : vector<8x32xf32>
    %356 = arith.mulf %350, %355 : vector<8x32xf32>
    %357 = arith.index_cast %336 : i32 to index
    %c0_101 = arith.constant 0 : index
    %358 = vector.load %arg7[%357, %c0_101] : memref<72x128xf32, #tpu.memory_space<vmem>>, vector<8x32xf32>
    tpu.vector_store %arg7[%357, %c0_101], %356 {strides = array<i32>} : memref<72x128xf32, #tpu.memory_space<vmem>>, vector<8x32xf32>,
    %c5_i32_102 = arith.constant 5 : i32
    %c8_i32_103 = arith.constant 8 : i32
    %359 = arith.muli %c5_i32_102, %c8_i32_103 : i32
    %360 = tpu.assume_multiple %359, 8 : i32
    %361 = arith.index_cast %360 : i32 to index
    %c0_104 = arith.constant 0 : index
    %362 = vector.load %arg8[%361, %c0_104] : memref<72x128xf32, #tpu.memory_space<vmem>>, vector<8x128xf32>
    %363 = arith.truncf %356 : vector<8x32xf32> to vector<8x32xbf16>
    %cst_105 = arith.constant dense<0.000000e+00> : vector<8x128xf32>
    %364 = tpu.matmul %363, %229, %cst_105 {dimension_numbers = #tpu.dot_dimension_numbers<[1], [0], [0], [1], [0, 0, 1, 1], [], []>} : vector<8x32xbf16>, vector<32x128xbf16>, vector<8x128xf32> -> vector<8x128xf32>
    %365 = arith.addf %362, %364 : vector<8x128xf32>
    %366 = arith.negf %365 : vector<8x128xf32>
    %367 = math.exp %366 : vector<8x128xf32>
    %cst_106 = arith.constant 1.000000e+00 : f32
    %368 = vector.broadcast %cst_106 : f32 to vector<8x128xf32>
    %369 = arith.addf %368, %367 : vector<8x128xf32>
    %370 = arith.divf %368, %369 : vector<8x128xf32>
    %371 = math.tanh %365 : vector<8x128xf32>
    %372 = vector.extract_strided_slice %370 {offsets = [0, 0], sizes = [8, 32], strides = [1, 1]} : vector<8x128xf32> to vector<8x32xf32>
    %373 = vector.extract_strided_slice %370 {offsets = [0, 32], sizes = [8, 32], strides = [1, 1]} : vector<8x128xf32> to vector<8x32xf32>
    %374 = vector.extract_strided_slice %370 {offsets = [0, 96], sizes = [8, 32], strides = [1, 1]} : vector<8x128xf32> to vector<8x32xf32>
    %375 = vector.extract_strided_slice %371 {offsets = [0, 64], sizes = [8, 32], strides = [1, 1]} : vector<8x128xf32> to vector<8x32xf32>
    %376 = arith.mulf %373, %354 : vector<8x32xf32>
    %377 = arith.mulf %372, %375 : vector<8x32xf32>
    %378 = arith.addf %376, %377 : vector<8x32xf32>
    %379 = math.tanh %378 : vector<8x32xf32>
    %380 = arith.mulf %374, %379 : vector<8x32xf32>
    %381 = arith.index_cast %360 : i32 to index
    %c0_107 = arith.constant 0 : index
    %382 = vector.load %arg7[%381, %c0_107] : memref<72x128xf32, #tpu.memory_space<vmem>>, vector<8x32xf32>
    tpu.vector_store %arg7[%381, %c0_107], %380 {strides = array<i32>} : memref<72x128xf32, #tpu.memory_space<vmem>>, vector<8x32xf32>,
    %c6_i32_108 = arith.constant 6 : i32
    %c8_i32_109 = arith.constant 8 : i32
    %383 = arith.muli %c6_i32_108, %c8_i32_109 : i32
    %384 = tpu.assume_multiple %383, 8 : i32
    %385 = arith.index_cast %384 : i32 to index
    %c0_110 = arith.constant 0 : index
    %386 = vector.load %arg8[%385, %c0_110] : memref<72x128xf32, #tpu.memory_space<vmem>>, vector<8x128xf32>
    %387 = arith.truncf %380 : vector<8x32xf32> to vector<8x32xbf16>
    %cst_111 = arith.constant dense<0.000000e+00> : vector<8x128xf32>
    %388 = tpu.matmul %387, %229, %cst_111 {dimension_numbers = #tpu.dot_dimension_numbers<[1], [0], [0], [1], [0, 0, 1, 1], [], []>} : vector<8x32xbf16>, vector<32x128xbf16>, vector<8x128xf32> -> vector<8x128xf32>
    %389 = arith.addf %386, %388 : vector<8x128xf32>
    %390 = arith.negf %389 : vector<8x128xf32>
    %391 = math.exp %390 : vector<8x128xf32>
    %cst_112 = arith.constant 1.000000e+00 : f32
    %392 = vector.broadcast %cst_112 : f32 to vector<8x128xf32>
    %393 = arith.addf %392, %391 : vector<8x128xf32>
    %394 = arith.divf %392, %393 : vector<8x128xf32>
    %395 = math.tanh %389 : vector<8x128xf32>
    %396 = vector.extract_strided_slice %394 {offsets = [0, 0], sizes = [8, 32], strides = [1, 1]} : vector<8x128xf32> to vector<8x32xf32>
    %397 = vector.extract_strided_slice %394 {offsets = [0, 32], sizes = [8, 32], strides = [1, 1]} : vector<8x128xf32> to vector<8x32xf32>
    %398 = vector.extract_strided_slice %394 {offsets = [0, 96], sizes = [8, 32], strides = [1, 1]} : vector<8x128xf32> to vector<8x32xf32>
    %399 = vector.extract_strided_slice %395 {offsets = [0, 64], sizes = [8, 32], strides = [1, 1]} : vector<8x128xf32> to vector<8x32xf32>
    %400 = arith.mulf %397, %378 : vector<8x32xf32>
    %401 = arith.mulf %396, %399 : vector<8x32xf32>
    %402 = arith.addf %400, %401 : vector<8x32xf32>
    %403 = math.tanh %402 : vector<8x32xf32>
    %404 = arith.mulf %398, %403 : vector<8x32xf32>
    %405 = arith.index_cast %384 : i32 to index
    %c0_113 = arith.constant 0 : index
    %406 = vector.load %arg7[%405, %c0_113] : memref<72x128xf32, #tpu.memory_space<vmem>>, vector<8x32xf32>
    tpu.vector_store %arg7[%405, %c0_113], %404 {strides = array<i32>} : memref<72x128xf32, #tpu.memory_space<vmem>>, vector<8x32xf32>,
    %c7_i32_114 = arith.constant 7 : i32
    %c8_i32_115 = arith.constant 8 : i32
    %407 = arith.muli %c7_i32_114, %c8_i32_115 : i32
    %408 = tpu.assume_multiple %407, 8 : i32
    %409 = arith.index_cast %408 : i32 to index
    %c0_116 = arith.constant 0 : index
    %410 = vector.load %arg8[%409, %c0_116] : memref<72x128xf32, #tpu.memory_space<vmem>>, vector<8x128xf32>
    %411 = arith.truncf %404 : vector<8x32xf32> to vector<8x32xbf16>
    %cst_117 = arith.constant dense<0.000000e+00> : vector<8x128xf32>
    %412 = tpu.matmul %411, %229, %cst_117 {dimension_numbers = #tpu.dot_dimension_numbers<[1], [0], [0], [1], [0, 0, 1, 1], [], []>} : vector<8x32xbf16>, vector<32x128xbf16>, vector<8x128xf32> -> vector<8x128xf32>
    %413 = arith.addf %410, %412 : vector<8x128xf32>
    %414 = arith.negf %413 : vector<8x128xf32>
    %415 = math.exp %414 : vector<8x128xf32>
    %cst_118 = arith.constant 1.000000e+00 : f32
    %416 = vector.broadcast %cst_118 : f32 to vector<8x128xf32>
    %417 = arith.addf %416, %415 : vector<8x128xf32>
    %418 = arith.divf %416, %417 : vector<8x128xf32>
    %419 = math.tanh %413 : vector<8x128xf32>
    %420 = vector.extract_strided_slice %418 {offsets = [0, 0], sizes = [8, 32], strides = [1, 1]} : vector<8x128xf32> to vector<8x32xf32>
    %421 = vector.extract_strided_slice %418 {offsets = [0, 32], sizes = [8, 32], strides = [1, 1]} : vector<8x128xf32> to vector<8x32xf32>
    %422 = vector.extract_strided_slice %418 {offsets = [0, 96], sizes = [8, 32], strides = [1, 1]} : vector<8x128xf32> to vector<8x32xf32>
    %423 = vector.extract_strided_slice %419 {offsets = [0, 64], sizes = [8, 32], strides = [1, 1]} : vector<8x128xf32> to vector<8x32xf32>
    %424 = arith.mulf %421, %402 : vector<8x32xf32>
    %425 = arith.mulf %420, %423 : vector<8x32xf32>
    %426 = arith.addf %424, %425 : vector<8x32xf32>
    %427 = math.tanh %426 : vector<8x32xf32>
    %428 = arith.mulf %422, %427 : vector<8x32xf32>
    %429 = arith.index_cast %408 : i32 to index
    %c0_119 = arith.constant 0 : index
    %430 = vector.load %arg7[%429, %c0_119] : memref<72x128xf32, #tpu.memory_space<vmem>>, vector<8x32xf32>
    tpu.vector_store %arg7[%429, %c0_119], %428 {strides = array<i32>} : memref<72x128xf32, #tpu.memory_space<vmem>>, vector<8x32xf32>,
    %c8_i32_120 = arith.constant 8 : i32
    %c8_i32_121 = arith.constant 8 : i32
    %431 = arith.muli %c8_i32_120, %c8_i32_121 : i32
    %432 = tpu.assume_multiple %431, 8 : i32
    %433 = arith.index_cast %432 : i32 to index
    %c0_122 = arith.constant 0 : index
    %434 = vector.load %arg8[%433, %c0_122] : memref<72x128xf32, #tpu.memory_space<vmem>>, vector<8x128xf32>
    %435 = arith.truncf %428 : vector<8x32xf32> to vector<8x32xbf16>
    %cst_123 = arith.constant dense<0.000000e+00> : vector<8x128xf32>
    %436 = tpu.matmul %435, %229, %cst_123 {dimension_numbers = #tpu.dot_dimension_numbers<[1], [0], [0], [1], [0, 0, 1, 1], [], []>} : vector<8x32xbf16>, vector<32x128xbf16>, vector<8x128xf32> -> vector<8x128xf32>
    %437 = arith.addf %434, %436 : vector<8x128xf32>
    %438 = arith.negf %437 : vector<8x128xf32>
    %439 = math.exp %438 : vector<8x128xf32>
    %cst_124 = arith.constant 1.000000e+00 : f32
    %440 = vector.broadcast %cst_124 : f32 to vector<8x128xf32>
    %441 = arith.addf %440, %439 : vector<8x128xf32>
    %442 = arith.divf %440, %441 : vector<8x128xf32>
    %443 = math.tanh %437 : vector<8x128xf32>
    %444 = vector.extract_strided_slice %442 {offsets = [0, 0], sizes = [8, 32], strides = [1, 1]} : vector<8x128xf32> to vector<8x32xf32>
    %445 = vector.extract_strided_slice %442 {offsets = [0, 32], sizes = [8, 32], strides = [1, 1]} : vector<8x128xf32> to vector<8x32xf32>
    %446 = vector.extract_strided_slice %442 {offsets = [0, 96], sizes = [8, 32], strides = [1, 1]} : vector<8x128xf32> to vector<8x32xf32>
    %447 = vector.extract_strided_slice %443 {offsets = [0, 64], sizes = [8, 32], strides = [1, 1]} : vector<8x128xf32> to vector<8x32xf32>
    %448 = arith.mulf %445, %426 : vector<8x32xf32>
    %449 = arith.mulf %444, %447 : vector<8x32xf32>
    %450 = arith.addf %448, %449 : vector<8x32xf32>
    %451 = math.tanh %450 : vector<8x32xf32>
    %452 = arith.mulf %446, %451 : vector<8x32xf32>
    %453 = arith.index_cast %432 : i32 to index
    %c0_125 = arith.constant 0 : index
    %454 = vector.load %arg7[%453, %c0_125] : memref<72x128xf32, #tpu.memory_space<vmem>>, vector<8x32xf32>
    tpu.vector_store %arg7[%453, %c0_125], %452 {strides = array<i32>} : memref<72x128xf32, #tpu.memory_space<vmem>>, vector<8x32xf32>,
    %c9_i32_126 = arith.constant 9 : i32
    return
  }
}

</mosaic_0001>

<bundles_post_ra>
// kernel: tpu_custom_call.1
= control target key start
LH: loop header
LB: loop body
LE: loop exit
PB: predicated region body
PF: predicated region fallthrough
CT: control target
= control target key end

     0   :  { %12 = vsyncpa [#allocation4], 0  ;;  %s3029_s0 = inlined_call_operand.vmem [shape: bf16[72,32], index: 0, kind: input, shape index: {}]   ;;  %s3030_s1 = inlined_call_operand.hbm [shape: bf16[32,128], index: 1, kind: input, shape index: {}]   ;;  %s3031_s2 = inlined_call_operand.hbm [shape: bf16[32,128], index: 2, kind: input, shape index: {}]   ;;  %s3032_s3 = inlined_call_operand.vmem [shape: f32[1,128], index: 3, kind: input, shape index: {}]   ;;  %s3033_s4 = inlined_call_operand.vmem [shape: bf16[128,128], index: 4, kind: input, shape index: {}]   ;;  %s3034_s5 = inlined_call_operand.hbm [shape: bf16[32,128], index: 5, kind: input, shape index: {}]   ;;  %s3035_s6 = inlined_call_operand.vmem [shape: f32[1,128], index: 6, kind: input, shape index: {}]   ;;  %s3036_s7 = inlined_call_operand.hbm [shape: f32[72,128], index: 7, kind: output, shape index: {}]  }
   0x1   :  { %13 = vsyncpa [#allocation7], 0 }
   0x2   :  { %14 = vsyncpa [#allocation5], 0  ;;  %s2474_s24 = smov [#allocation6]   ;;  %s2475_s26 = smov [#allocation3]  }
   0x3   :  { %s34_s25 = sshll.u32 %s2474_s24, 4  ;;  %s22_s27 = sshll.u32 %s2475_s26, 4  ;;  %s35_s25 = int_to_ptr.vmem [resolvable:$true] %s34_s25  ;;  %s2526_s27 = int_to_ptr.vmem [resolvable:$true] %s22_s27 }
   0x4   :  { %s2380_s30 = scalar_lea.hbm %s3031_s2, 256 }
   0x5   :  { %p2381_p0 = scmp.ne.s32.totalorder %s3031_s2, %s2380_s30  ;;  %p2384_p1 = scmp.lt.u32.totalorder %s2380_s30, %s3031_s2 }
   0x7   :  { %p2386_p2 = pnand %p2384_p1, %p2381_p0 }
   0x9   :  { %2389 = shalt.err (!%p2386_p2)
}
   0xa   :  { %s2390_s12 = scalar_lea.vmem %s35_s25, 256  ;;  %p2395_p4 = scmp.lt.s32.totalorder %s35_s25, %s35_s25 }
   0xb   :  { %p2391_p3 = scmp.ne.s32.totalorder %s35_s25, %s2390_s12  ;;  %p2396_p5 = scmp.lt.s32.totalorder %s2390_s12, %s2390_s12 }
   0xd   :  { %p2397_p6 = por %p2396_p5, %p2395_p4 }
   0xf   :  { %p2398_p7 = pnand %p2397_p6, %p2391_p3 }
  0x11   :  { %2401 = shalt.err (!%p2398_p7)
}
  0x12   :  { %s2476_s13 = smov 64   ;;  %s2477_s14 = smov 4  }
  0x13   :  { %40 = dma.hbm_to_vmem [thread:$0]  %s3031_s2, 256, %s35_s25, [#allocation7], %s2476_s13, %s2476_s13, %s2477_s14  }
  0x14   :  { %s2402_s19 = scalar_lea.hbm %s3030_s1, 256 }
  0x15   :  { %p2403_p8 = scmp.ne.s32.totalorder %s3030_s1, %s2402_s19  ;;  %p2406_p9 = scmp.lt.u32.totalorder %s2402_s19, %s3030_s1 }
  0x17   :  { %p2408_p10 = pnand %p2406_p9, %p2403_p8 }
  0x19   :  { %2411 = shalt.err (!%p2408_p10)
}
  0x1a   :  { %s2412_s24 = scalar_lea.vmem %s2526_s27, 256  ;;  %p2417_p12 = scmp.lt.s32.totalorder %s2526_s27, %s2526_s27 }
  0x1b   :  { %p2413_p11 = scmp.ne.s32.totalorder %s2526_s27, %s2412_s24  ;;  %p2418_p13 = scmp.lt.s32.totalorder %s2412_s24, %s2412_s24 }
  0x1d   :  { %p2419_p0 = por %p2418_p13, %p2417_p12 }
  0x1f   :  { %p2420_p1 = pnand %p2419_p0, %p2413_p11 }
  0x21   :  { %2423 = shalt.err (!%p2420_p1)
}
  0x22   :  { %28 = dma.hbm_to_vmem [thread:$0]  %s3030_s1, 256, %s2526_s27, [#allocation4], %s2476_s13, %s2476_s13, %s2477_s14  }
  0x23   :  { %s2478_s26 = smov [#allocation8]   ;;  %s2424_s8 = scalar_lea.hbm %s3034_s5, 256 }
  0x24   :  { %s50_s28 = sshll.u32 %s2478_s26, 4  ;;  %p2425_p2 = scmp.ne.s32.totalorder %s3034_s5, %s2424_s8  ;;  %s51_s28 = int_to_ptr.vmem [resolvable:$true] %s50_s28 }
  0x25   :  { %p2428_p3 = scmp.lt.u32.totalorder %s2424_s8, %s3034_s5 }
  0x27   :  { %p2430_p4 = pnand %p2428_p3, %p2425_p2 }
  0x29   :  { %2433 = shalt.err (!%p2430_p4)
}
  0x2a   :  { %s2434_s15 = scalar_lea.vmem %s51_s28, 256  ;;  %p2439_p6 = scmp.lt.s32.totalorder %s51_s28, %s51_s28 }
  0x2b   :  { %p2435_p5 = scmp.ne.s32.totalorder %s51_s28, %s2434_s15  ;;  %p2440_p7 = scmp.lt.s32.totalorder %s2434_s15, %s2434_s15 }
  0x2d   :  { %p2441_p8 = por %p2440_p7, %p2439_p6 }
  0x2f   :  { %p2442_p9 = pnand %p2441_p8, %p2435_p5 }
  0x31   :  { %2445 = shalt.err (!%p2442_p9)
}
  0x32   :  { %56 = dma.hbm_to_vmem [thread:$0]  %s3034_s5, 256, %s51_s28, [#allocation7], %s2476_s13, %s2476_s13, %s2477_s14  }
  0x33   :  { %2468 = dma.done.wait [#allocation4], 256  }
  0x34   :  { %2469 = vsyncadd [#allocation4], 4294967040 }
  0x35   :  { %2470 = dma.done.wait [#allocation7], 512  }
  0x36   :  { %2471 = vsyncadd [#allocation7], 4294966784  ;;  %v2479_v0 = vmov 0.0   ;;  %vm2480_vm0 = vmmov 0   ;;  %v2215_v1 = vld [vmem:[#allocation3] sm:$0xff]   ;;  %v2593_v2 = vld [vmem:[#allocation6] sm:$0xff]  }
  0x37   :  { %1989 = vmatprep.subr.bf16.mxu0 %v2479_v0  ;;  %69 = vst [vmem:[#allocation9] sm:$0xff] %v2479_v0  ;;  %70 = vst [vmem:[#allocation9 + $0x8] sm:$0xff] %v2479_v0  ;;  %2013 = vmatprep.subr.bf16.mxu1 %v2479_v0  ;;  %v2217_v3 = vld [vmem:[#allocation3 + $0x8] sm:$0xff]   ;;  %v2597_v4 = vld [vmem:[#allocation6 + $0x8] sm:$0xff]   ;;  %vm137_vm1 = vcmask 261120   ;;  %v2481_v6 = vmov 0  }
  0x38   :  { %71 = vst [vmem:[#allocation9 + $0x10] sm:$0xff] %v2479_v0  ;;  %72 = vst [vmem:[#allocation9 + $0x18] sm:$0xff] %v2479_v0  ;;  %1993 = vmatprep.mubr.msk.bf16.mxu0 %vm2480_vm0, %v2479_v0  ;;  %2017 = vmatprep.mubr.msk.bf16.mxu1 %vm2480_vm0, %v2479_v0  ;;  %v2219_v5 = vld [vmem:[%s3029_s0] sm:$0xff]   ;;  %s2482_s18 = smov 32   ;;  %v2220_v49 = vld [vmem:[%s3029_s0 + $0x8] sm:$0xff]  }
  0x39   :  { %73 = vst [vmem:[#allocation9 + $0x20] sm:$0xff] %v2479_v0  ;;  %74 = vst [vmem:[#allocation9 + $0x28] sm:$0xff] %v2479_v0  ;;  %1990 = vmatpush3.bf16.msra.mxu0 %v2215_v1  ;;  %2014 = vmatpush3.bf16.msra.mxu1 %v2593_v2  ;;  %v2623_v7 = vld [vmem:[%s3032_s3] ss:$0 sm:$0xff] }
  0x3a   :  { %75 = vst [vmem:[#allocation9 + $0x30] sm:$0xff] %v2479_v0  ;;  %76 = vst [vmem:[#allocation9 + $0x38] sm:$0xff] %v2479_v0  ;;  %1991 = vmatprep.subr.bf16.mxu0 %v2479_v0  ;;  %2015 = vmatprep.subr.bf16.mxu1 %v2479_v0 }
  0x3b   :  { %77 = vst [vmem:[#allocation9 + $0x40] sm:$0xff] %v2479_v0 }
  0x3d   :  { %1992 = vmatpush3.bf16.msra.mxu0 %v2217_v3  ;;  %2016 = vmatpush3.bf16.msra.mxu1 %v2597_v4 }
  0x3e   :  { %2053 = vmatprep.subr.bf16.mxu0 %v2479_v0  ;;  %2021 = vmatprep.subr.bf16.mxu1 %v2479_v0 }
  0x40   :  { %1994 = vmatmul.mubr.msk.bf16.vlgmr.msra.gmra.mrb[0].mxu0 %vm137_vm1, %v2219_v5  ;;  %2018 = vmatmul.mubr.bf16.vlgmr.msra.gmra.mrb[0].mxu1 %v2481_v6 }
  0x41   :  { %1997 = vmatprep.mubr.msk.bf16.mxu0 %vm2480_vm0, %v2479_v0  ;;  %2022 = vmatpush3.bf16.msra.mxu1 %v2593_v2 }
  0x42   :  { %2025 = vmatprep.mubr.msk.bf16.mxu1 %vm2480_vm0, %v2479_v0  ;;  %2023 = vmatprep.subr.bf16.mxu1 %v2479_v0 }
  0x43   :  { %2054 = vmatpush3.bf16.msra.mxu0 %v2593_v2 }
  0x44   :  { %2055 = vmatprep.subr.bf16.mxu0 %v2479_v0 }
  0x45   :  { %2024 = vmatpush3.bf16.msra.mxu1 %v2597_v4 }
  0x46   :  { %2029 = vmatprep.subr.bf16.mxu1 %v2479_v0 }
  0x47   :  { %2056 = vmatpush3.bf16.msra.mxu0 %v2597_v4 }
  0x48   :  { %2069 = vmatprep.subr.bf16.mxu0 %v2479_v0  ;;  %1998 = vmatmul.mubr.msk.bf16.gmra.mrb[4].mxu0 %vm137_vm1, %v2220_v49 }
  0x49   :  { %2001 = vmatprep.mubr.msk.bf16.mxu0 %vm2480_vm0, %v2479_v0 }
 0x113   :  { %v187_v8 = vpop.f32.mrb[0].mxu0  ;;  %v284_v10 = vpop.f32.mrb[0].mxu1 }
 0x114   :  { %v188_v9 = vadd.f32 %v2623_v7, %v187_v8  ;;  %v1995_v11 = vpop.f32.mrb[1].mxu0  ;;  %v2019_v12 = vpop.f32.mrb[1].mxu1 }
 0x115   :  { %v190_v13 = vpop.f32.mrb[2].mxu0  ;;  %v287_v15 = vpop.f32.mrb[2].mxu1 }
 0x116   :  { %v290_v14 = vadd.f32 %v284_v10, %v188_v9  ;;  %v1996_v16 = vpop.f32.mrb[3].mxu0  ;;  %v2020_v17 = vpop.f32.mrb[3].mxu1  ;;  %v191_v33 = vadd.f32 %v2623_v7, %v190_v13 }
 0x118   :  { %2234 = vtanh.f32 %v290_v14  ;;  %v1870_v19 = vmul.f32 -1.442695, %v290_v14 }
 0x11a   :  { %2236 = vpow2.f32 %v1870_v19 }
 0x11b   :  { %v195_v54 = vpop.f32.mrb[4].mxu0 }
 0x11c   :  { %v1999_v55 = vpop.f32.mrb[5].mxu0  ;;  %v196_v59 = vadd.f32 %v2623_v7, %v195_v54 }
 0x11d   :  { %v198_v56 = vpop.f32.mrb[6].mxu0 }
 0x11e   :  { %v2000_v57 = vpop.f32.mrb[7].mxu0 }
 0x122   :  { %v2235_v18 = vpop.eup %2234 }
 0x123   :  { %300 = vrot.lane.b32.xlu0 %v2235_v18, %s2476_s13 }
 0x124   :  { %v2237_v20 = vpop.eup %2236 }
 0x125   :  { %v294_v21 = vadd.f32 1.0, %v2237_v20 }
 0x127   :  { %2238 = vrcp.f32 %v294_v21  ;;  %v199_v21 = vadd.f32 %v2623_v7, %v198_v56 }
 0x131   :  { %v2239_v22 = vpop.eup %2238 }
 0x132   :  { %v298_v25 = vmul.f32 0.0, %v2239_v22 }
 0x195   :  { %v301_v23 = vpop.permute.xlu0 %300 }
 0x196   :  { %v303_v24 = vmul.f32 %v2239_v22, %v301_v23 }
 0x198   :  { %305 = vrot.lane.b32.xlu0 %v303_v24, %s2482_s18 }
 0x20a   :  { %v306_v26 = vpop.permute.xlu0 %305 }
 0x20b   :  { %v308_v27 = vadd.f32 %v306_v26, %v298_v25 }
 0x20d   :  { %2240 = vtanh.f32 %v308_v27 }
 0x217   :  { %v2241_v28 = vpop.eup %2240 }
 0x218   :  { %311 = vrot.lane.b32.xlu1 %v2241_v28, %s2476_s13 }
 0x28a   :  { %v312_v29 = vpop.permute.xlu1 %311 }
 0x28b   :  { %v2629_v30 = vmul.f32 %v2239_v22, %v312_v29 }
 0x28d   :  { %v322_v31 = vpack.c.bf16 %v2629_v30, %v2629_v30 }
 0x28f   :  { %324 = vrot.lane.b32.xlu1 %v322_v31, %s2482_s18 }
 0x301   :  { %v325_v32 = vpop.permute.xlu1 %324 }
 0x302   :  { %2026 = vmatmul.mubr.msk.bf16.vlgmr.msra.gmra.mrb[4].mxu1 %vm137_vm1, %v325_v32 }
 0x303   :  { %2030 = vmatpush3.bf16.msra.mxu1 %v2593_v2  ;;  %2033 = vmatprep.mubr.msk.bf16.mxu1 %vm2480_vm0, %v2479_v0 }
 0x304   :  { %2031 = vmatprep.subr.bf16.mxu1 %v2479_v0 }
 0x307   :  { %2032 = vmatpush3.bf16.msra.mxu1 %v2597_v4 }
 0x308   :  { %2037 = vmatprep.subr.bf16.mxu1 %v2479_v0 }
 0x3d5   :  { %v363_v34 = vpop.f32.mrb[4].mxu1 }
 0x3d6   :  { %v369_v35 = vadd.f32 %v363_v34, %v191_v33  ;;  %v2027_v36 = vpop.f32.mrb[5].mxu1 }
 0x3d7   :  { %v366_v37 = vpop.f32.mrb[6].mxu1 }
 0x3d8   :  { %2242 = vtanh.f32 %v369_v35  ;;  %v2028_v38 = vpop.f32.mrb[7].mxu1  ;;  %v1872_v40 = vmul.f32 -1.442695, %v369_v35 }
 0x3d9   :  { %v2221_v38 = vld [vmem:[%s3029_s0 + $0x10] sm:$0xff]  }
 0x3da   :  { %2244 = vpow2.f32 %v1872_v40  ;;  %2002 = vmatmul.mubr.msk.bf16.gmra.mrb[8].mxu0 %vm137_vm1, %v2221_v38 }
 0x3db   :  { %2005 = vmatprep.mubr.msk.bf16.mxu0 %vm2480_vm0, %v2479_v0 }
 0x3e2   :  { %v2243_v39 = vpop.eup %2242 }
 0x3e3   :  { %379 = vrot.lane.b32.xlu0 %v2243_v39, %s2476_s13 }
 0x3e4   :  { %v2245_v41 = vpop.eup %2244 }
 0x3e5   :  { %v373_v42 = vadd.f32 1.0, %v2245_v41 }
 0x3e7   :  { %2246 = vrcp.f32 %v373_v42 }
 0x3f1   :  { %v2247_v43 = vpop.eup %2246 }
 0x3f2   :  { %v377_v46 = vmul.f32 %v2247_v43, %v308_v27 }
 0x455   :  { %v380_v44 = vpop.permute.xlu0 %379 }
 0x456   :  { %v382_v45 = vmul.f32 %v2247_v43, %v380_v44 }
 0x458   :  { %384 = vrot.lane.b32.xlu1 %v382_v45, %s2482_s18 }
 0x4ca   :  { %v385_v47 = vpop.permute.xlu1 %384 }
 0x4cb   :  { %v387_v48 = vadd.f32 %v385_v47, %v377_v46 }
 0x4cd   :  { %2248 = vtanh.f32 %v387_v48 }
 0x4d7   :  { %v2249_v50 = vpop.eup %2248 }
 0x4d8   :  { %390 = vrot.lane.b32.xlu0 %v2249_v50, %s2476_s13 }
 0x54a   :  { %v391_v51 = vpop.permute.xlu0 %390 }
 0x54b   :  { %v2651_v52 = vmul.f32 %v2247_v43, %v391_v51  ;;  %v203_v43 = vpop.f32.mrb[8].mxu0 }
 0x54c   :  { %v2003_v44 = vpop.f32.mrb[9].mxu0 }
 0x54d   :  { %v402_v53 = vpack.c.bf16 %v2651_v52, %v2651_v52  ;;  %v206_v45 = vpop.f32.mrb[10].mxu0 }
 0x54e   :  { %v2004_v46 = vpop.f32.mrb[11].mxu0 }
 0x54f   :  { %404 = vrot.lane.b32.xlu1 %v402_v53, %s2482_s18 }
 0x5c1   :  { %v405_v58 = vpop.permute.xlu1 %404 }
 0x5c2   :  { %2034 = vmatmul.mubr.msk.bf16.vlgmr.msra.gmra.mrb[8].mxu1 %vm137_vm1, %v405_v58 }
 0x5c3   :  { %2038 = vmatpush3.bf16.msra.mxu1 %v2593_v2  ;;  %2041 = vmatprep.mubr.msk.bf16.mxu1 %vm2480_vm0, %v2479_v0 }
 0x5c4   :  { %2039 = vmatprep.subr.bf16.mxu1 %v2479_v0 }
 0x5c7   :  { %2040 = vmatpush3.bf16.msra.mxu1 %v2597_v4 }
 0x5c8   :  { %2045 = vmatprep.subr.bf16.mxu1 %v2479_v0 }
 0x695   :  { %v443_v60 = vpop.f32.mrb[8].mxu1 }
 0x696   :  { %v449_v61 = vadd.f32 %v443_v60, %v196_v59  ;;  %v2035_v62 = vpop.f32.mrb[9].mxu1 }
 0x697   :  { %v446_v63 = vpop.f32.mrb[10].mxu1 }
 0x698   :  { %2250 = vtanh.f32 %v449_v61  ;;  %v2036_v1 = vpop.f32.mrb[11].mxu1  ;;  %v1874_v5 = vmul.f32 -1.442695, %v449_v61 }
 0x69a   :  { %2252 = vpow2.f32 %v1874_v5  ;;  %v2223_v5 = vld [vmem:[%s3029_s0 + $0x20] ss:$0 sps:$4 sm:$0xff]  }
 0x6a2   :  { %v2251_v3 = vpop.eup %2250 }
 0x6a3   :  { %459 = vrot.lane.b32.xlu0 %v2251_v3, %s2476_s13  ;;  %v2222_v3 = vld [vmem:[%s3029_s0 + $0x18] sm:$0xff]  }
 0x6a4   :  { %v2253_v8 = vpop.eup %2252  ;;  %2006 = vmatmul.mubr.msk.bf16.gmra.mrb[12].mxu0 %vm137_vm1, %v2222_v3 }
 0x6a5   :  { %v453_v9 = vadd.f32 1.0, %v2253_v8  ;;  %2009 = vmatprep.mubr.msk.bf16.mxu0 %vm2480_vm0, %v2479_v0 }
 0x6a7   :  { %2254 = vrcp.f32 %v453_v9 }
 0x6ac   :  { %2010 = vmatmul.mubr.msk.bf16.gmra.mrb[16].mxu0 %vm137_vm1, %v2223_v5 }
 0x6ad   :  { %2057 = vmatprep.mubr.msk.bf16.mxu0 %vm2480_vm0, %v2479_v0 }
 0x6b1   :  { %v2255_v10 = vpop.eup %2254 }
 0x6b2   :  { %v457_v13 = vmul.f32 %v2255_v10, %v387_v48  ;;  %v204_v48 = vadd.f32 %v2623_v7, %v203_v43 }
 0x715   :  { %v460_v11 = vpop.permute.xlu0 %459 }
 0x716   :  { %v462_v12 = vmul.f32 %v2255_v10, %v460_v11 }
 0x718   :  { %464 = vrot.lane.b32.xlu1 %v462_v12, %s2482_s18 }
 0x777   :  { %v211_v12 = vpop.f32.mrb[12].mxu0 }
 0x78a   :  { %v465_v14 = vpop.permute.xlu1 %464 }
 0x78b   :  { %v467_v15 = vadd.f32 %v465_v14, %v457_v13  ;;  %v2007_v13 = vpop.f32.mrb[13].mxu0 }
 0x78c   :  { %v2722_v14 = vpop.f32.mrb[14].mxu0 }
 0x78d   :  { %2256 = vtanh.f32 %v467_v15 }
 0x797   :  { %v2257_v16 = vpop.eup %2256 }
 0x798   :  { %470 = vrot.lane.b32.xlu0 %v2257_v16, %s2476_s13 }
 0x80a   :  { %v471_v17 = vpop.permute.xlu0 %470 }
 0x80b   :  { %v2667_v18 = vmul.f32 %v2255_v10, %v471_v17  ;;  %v207_v17 = vadd.f32 %v2623_v7, %v206_v45 }
 0x80d   :  { %v482_v19 = vpack.c.bf16 %v2667_v18, %v2667_v18 }
 0x80f   :  { %484 = vrot.lane.b32.xlu1 %v482_v19, %s2482_s18 }
 0x881   :  { %v485_v20 = vpop.permute.xlu1 %484 }
 0x882   :  { %2042 = vmatmul.mubr.msk.bf16.vlgmr.msra.gmra.mrb[12].mxu1 %vm137_vm1, %v485_v20 }
 0x883   :  { %2046 = vmatpush3.bf16.msra.mxu1 %v2593_v2  ;;  %2049 = vmatprep.mubr.msk.bf16.mxu1 %vm2480_vm0, %v2479_v0 }
 0x884   :  { %2047 = vmatprep.subr.bf16.mxu1 %v2479_v0 }
 0x887   :  { %2048 = vmatpush3.bf16.msra.mxu1 %v2597_v4 }
 0x888   :  { %2061 = vmatprep.subr.bf16.mxu1 %v2479_v0 }
 0x955   :  { %v523_v22 = vpop.f32.mrb[12].mxu1 }
 0x956   :  { %v529_v23 = vadd.f32 %v523_v22, %v199_v21  ;;  %v2043_v24 = vpop.f32.mrb[13].mxu1 }
 0x957   :  { %v526_v25 = vpop.f32.mrb[14].mxu1 }
 0x958   :  { %2258 = vtanh.f32 %v529_v23  ;;  %v2044_v26 = vpop.f32.mrb[15].mxu1  ;;  %v1876_v28 = vmul.f32 -1.442695, %v529_v23 }
 0x95a   :  { %2260 = vpow2.f32 %v1876_v28 }
 0x962   :  { %v2259_v27 = vpop.eup %2258 }
 0x963   :  { %539 = vrot.lane.b32.xlu0 %v2259_v27, %s2476_s13 }
 0x964   :  { %v2261_v29 = vpop.eup %2260 }
 0x965   :  { %v533_v31 = vadd.f32 1.0, %v2261_v29 }
 0x967   :  { %2262 = vrcp.f32 %v533_v31 }
 0x971   :  { %v2263_v32 = vpop.eup %2262 }
 0x972   :  { %v537_v35 = vmul.f32 %v2263_v32, %v467_v15  ;;  %v2008_v15 = vpop.f32.mrb[15].mxu0 }
 0x9d5   :  { %v540_v33 = vpop.permute.xlu0 %539 }
 0x9d6   :  { %v542_v34 = vmul.f32 %v2263_v32, %v540_v33 }
 0x9d8   :  { %544 = vrot.lane.b32.xlu1 %v542_v34, %s2482_s18 }
 0xa4a   :  { %v545_v36 = vpop.permute.xlu1 %544 }
 0xa4b   :  { %v547_v37 = vadd.f32 %v545_v36, %v537_v35 }
 0xa4d   :  { %2264 = vtanh.f32 %v547_v37 }
 0xa57   :  { %v2265_v39 = vpop.eup %2264 }
 0xa58   :  { %550 = vrot.lane.b32.xlu0 %v2265_v39, %s2476_s13 }
 0xaca   :  { %v551_v40 = vpop.permute.xlu0 %550 }
 0xacb   :  { %v2689_v41 = vmul.f32 %v2263_v32, %v551_v40  ;;  %v212_v40 = vadd.f32 %v2623_v7, %v211_v12 }
 0xacd   :  { %v562_v42 = vpack.c.bf16 %v2689_v41, %v2689_v41 }
 0xacf   :  { %564 = vrot.lane.b32.xlu1 %v562_v42, %s2482_s18 }
 0xb41   :  { %v565_v47 = vpop.permute.xlu1 %564 }
 0xb42   :  { %2050 = vmatmul.mubr.msk.bf16.vlgmr.msra.gmra.mrb[16].mxu1 %vm137_vm1, %v565_v47 }
 0xb43   :  { %2062 = vmatpush3.bf16.msra.mxu1 %v2593_v2  ;;  %2065 = vmatprep.mubr.msk.bf16.mxu1 %vm2480_vm0, %v2479_v0 }
 0xb44   :  { %2063 = vmatprep.subr.bf16.mxu1 %v2479_v0 }
 0xb47   :  { %2064 = vmatpush3.bf16.msra.mxu1 %v2597_v4 }
 0xb48   :  { %2085 = vmatprep.subr.bf16.mxu1 %v2479_v0 }
 0xc15   :  { %v603_v49 = vpop.f32.mrb[16].mxu1 }
 0xc16   :  { %v609_v50 = vadd.f32 %v603_v49, %v204_v48  ;;  %v2051_v51 = vpop.f32.mrb[17].mxu1 }
 0xc17   :  { %v606_v53 = vpop.f32.mrb[18].mxu1 }
 0xc18   :  { %2266 = vtanh.f32 %v609_v50  ;;  %v2052_v54 = vpop.f32.mrb[19].mxu1  ;;  %v1878_v56 = vmul.f32 -1.442695, %v609_v50 }
 0xc1a   :  { %2268 = vpow2.f32 %v1878_v56 }
 0xc22   :  { %v2267_v55 = vpop.eup %2266 }
 0xc23   :  { %619 = vrot.lane.b32.xlu0 %v2267_v55, %s2476_s13 }
 0xc24   :  { %v2269_v57 = vpop.eup %2268 }
 0xc25   :  { %v613_v58 = vadd.f32 1.0, %v2269_v57 }
 0xc27   :  { %2270 = vrcp.f32 %v613_v58 }
 0xc31   :  { %v2271_v59 = vpop.eup %2270 }
 0xc32   :  { %v617_v62 = vmul.f32 %v2271_v59, %v547_v37 }
 0xc95   :  { %v620_v60 = vpop.permute.xlu0 %619 }
 0xc96   :  { %v622_v61 = vmul.f32 %v2271_v59, %v620_v60 }
 0xc98   :  { %624 = vrot.lane.b32.xlu1 %v622_v61, %s2482_s18 }
 0xd0a   :  { %v625_v63 = vpop.permute.xlu1 %624 }
 0xd0b   :  { %v627_v1 = vadd.f32 %v625_v63, %v617_v62  ;;  %v215_v63 = vadd.f32 %v2623_v7, %v2722_v14  ;;  %v2224_v7 = vld [vmem:[%s3033_s4] sm:$0xff]   ;;  %v2225_v14 = vld [vmem:[%s3033_s4 + $0x8] sm:$0xff]  }
 0xd0d   :  { %2272 = vtanh.f32 %v627_v1 }
 0xd17   :  { %v2273_v8 = vpop.eup %2272 }
 0xd18   :  { %630 = vrot.lane.b32.xlu0 %v2273_v8, %s2476_s13 }
 0xd8a   :  { %v631_v9 = vpop.permute.xlu0 %630 }
 0xd8b   :  { %v2717_v10 = vmul.f32 %v2271_v59, %v631_v9 }
 0xd8d   :  { %v642_v11 = vpack.c.bf16 %v2717_v10, %v2717_v10 }
 0xd8f   :  { %644 = vrot.lane.b32.xlu1 %v642_v11, %s2482_s18 }
 0xe01   :  { %v645_v16 = vpop.permute.xlu1 %644 }
 0xe02   :  { %2058 = vmatmul.mubr.msk.bf16.vlgmr.msra.gmra.mrb[20].mxu0 %vm137_vm1, %v645_v16 }
 0xe03   :  { %2070 = vmatpush3.bf16.msra.mxu0 %v2593_v2  ;;  %2073 = vmatprep.mubr.msk.bf16.mxu0 %vm2480_vm0, %v2479_v0 }
 0xe04   :  { %2071 = vmatprep.subr.bf16.mxu0 %v2479_v0 }
 0xe07   :  { %2072 = vmatpush3.bf16.msra.mxu0 %v2597_v4 }
 0xe08   :  { %2077 = vmatprep.subr.bf16.mxu0 %v2479_v0 }
 0xed5   :  { %v683_v19 = vpop.f32.mrb[20].mxu0 }
 0xed6   :  { %v689_v20 = vadd.f32 %v683_v19, %v207_v17  ;;  %v2059_v21 = vpop.f32.mrb[21].mxu0  ;;  %v2226_v17 = vld [vmem:[%s3033_s4 + $0x10] sm:$0xff]   ;;  %v2228_v19 = vld [vmem:[%s3033_s4 + $0x20] sm:$0xff]  }
 0xed7   :  { %v686_v22 = vpop.f32.mrb[22].mxu0 }
 0xed8   :  { %2274 = vtanh.f32 %v689_v20  ;;  %v2060_v23 = vpop.f32.mrb[23].mxu0  ;;  %v1880_v25 = vmul.f32 -1.442695, %v689_v20 }
 0xed9   :  { %v2229_v23 = vld [vmem:[%s3033_s4 + $0x28] sm:$0xff]  }
 0xeda   :  { %2276 = vpow2.f32 %v1880_v25  ;;  %v2230_v25 = vld [vmem:[%s3033_s4 + $0x30] sm:$0xff]  }
 0xee2   :  { %v2275_v24 = vpop.eup %2274 }
 0xee3   :  { %699 = vrot.lane.b32.xlu0 %v2275_v24, %s2476_s13 }
 0xee4   :  { %v2277_v26 = vpop.eup %2276 }
 0xee5   :  { %v693_v27 = vadd.f32 1.0, %v2277_v26  ;;  %v2231_v26 = vld [vmem:[%s3033_s4 + $0x38] sm:$0xff]  }
 0xee7   :  { %2278 = vrcp.f32 %v693_v27 }
 0xef1   :  { %v2279_v28 = vpop.eup %2278 }
 0xef2   :  { %v697_v32 = vmul.f32 %v2279_v28, %v627_v1 }
 0xf55   :  { %v700_v29 = vpop.permute.xlu0 %699 }
 0xf56   :  { %v702_v31 = vmul.f32 %v2279_v28, %v700_v29 }
 0xf58   :  { %704 = vrot.lane.b32.xlu1 %v702_v31, %s2482_s18 }
 0xfca   :  { %v705_v33 = vpop.permute.xlu1 %704 }
 0xfcb   :  { %v707_v34 = vadd.f32 %v705_v33, %v697_v32 }
 0xfcd   :  { %2280 = vtanh.f32 %v707_v34 }
 0xfd7   :  { %v2281_v35 = vpop.eup %2280 }
 0xfd8   :  { %710 = vrot.lane.b32.xlu0 %v2281_v35, %s2476_s13 }
0x104a   :  { %v711_v36 = vpop.permute.xlu0 %710 }
0x104b   :  { %v2735_v37 = vmul.f32 %v2279_v28, %v711_v36  ;;  %v2810_v36 = vld [vmem:[#allocation8] sm:$0xff]  }
0x104d   :  { %v722_v38 = vpack.c.bf16 %v2735_v37, %v2735_v37 }
0x104f   :  { %724 = vrot.lane.b32.xlu1 %v722_v38, %s2482_s18 }
0x10c1   :  { %v725_v39 = vpop.permute.xlu1 %724 }
0x10c2   :  { %2066 = vmatmul.mubr.msk.bf16.vlgmr.msra.gmra.mrb[20].mxu1 %vm137_vm1, %v725_v39 }
0x10c3   :  { %2101 = vmatprep.mubr.msk.bf16.mxu1 %vm2480_vm0, %v2479_v0  ;;  %2086 = vmatpush3.bf16.msra.mxu1 %v2224_v7 }
0x10c4   :  { %2087 = vmatprep.subr.bf16.mxu1 %v2479_v0 }
0x10c7   :  { %2088 = vmatpush3.bf16.msra.mxu1 %v2225_v14 }
0x10c8   :  { %2089 = vmatprep.subr.bf16.mxu1 %v2479_v0 }
0x10cb   :  { %2090 = vmatpush3.bf16.msra.mxu1 %v2226_v17 }
0x10cc   :  { %2091 = vmatprep.subr.bf16.mxu1 %v2479_v0 }
0x1195   :  { %v763_v42 = vpop.f32.mrb[20].mxu1 }
0x1196   :  { %v769_v43 = vadd.f32 %v763_v42, %v212_v40  ;;  %v2067_v44 = vpop.f32.mrb[21].mxu1 }
0x1197   :  { %v766_v45 = vpop.f32.mrb[22].mxu1 }
0x1198   :  { %2282 = vtanh.f32 %v769_v43  ;;  %v2068_v46 = vpop.f32.mrb[23].mxu1  ;;  %v1882_v48 = vmul.f32 -1.442695, %v769_v43 }
0x119a   :  { %2284 = vpow2.f32 %v1882_v48 }
0x11a2   :  { %v2283_v47 = vpop.eup %2282 }
0x11a3   :  { %779 = vrot.lane.b32.xlu0 %v2283_v47, %s2476_s13  ;;  %v2839_v47 = vld [vmem:[%s3035_s6] ss:$0 sm:$0xff] }
0x11a4   :  { %v2285_v49 = vpop.eup %2284 }
0x11a5   :  { %v773_v50 = vadd.f32 1.0, %v2285_v49 }
0x11a7   :  { %2286 = vrcp.f32 %v773_v50 }
0x11b1   :  { %v2287_v51 = vpop.eup %2286 }
0x11b2   :  { %v777_v55 = vmul.f32 %v2287_v51, %v707_v34 }
0x1215   :  { %v780_v53 = vpop.permute.xlu0 %779 }
0x1216   :  { %v782_v54 = vmul.f32 %v2287_v51, %v780_v53 }
0x1218   :  { %784 = vrot.lane.b32.xlu1 %v782_v54, %s2482_s18 }
0x128a   :  { %v785_v56 = vpop.permute.xlu1 %784 }
0x128b   :  { %v787_v57 = vadd.f32 %v785_v56, %v777_v55 }
0x128d   :  { %2288 = vtanh.f32 %v787_v57 }
0x1297   :  { %v2289_v58 = vpop.eup %2288 }
0x1298   :  { %790 = vrot.lane.b32.xlu0 %v2289_v58, %s2476_s13 }
0x130a   :  { %v791_v59 = vpop.permute.xlu0 %790 }
0x130b   :  { %v2747_v60 = vmul.f32 %v2287_v51, %v791_v59 }
0x130d   :  { %v802_v61 = vpack.c.bf16 %v2747_v60, %v2747_v60 }
0x130f   :  { %804 = vrot.lane.b32.xlu1 %v802_v61, %s2482_s18 }
0x1381   :  { %v805_v62 = vpop.permute.xlu1 %804 }
0x1382   :  { %2074 = vmatmul.mubr.msk.bf16.vlgmr.msra.gmra.mrb[24].mxu0 %vm137_vm1, %v805_v62 }
0x1383   :  { %2078 = vmatpush3.bf16.msra.mxu0 %v2593_v2  ;;  %2081 = vmatprep.mubr.msk.bf16.mxu0 %vm2480_vm0, %v2479_v0 }
0x1384   :  { %2079 = vmatprep.subr.bf16.mxu0 %v2479_v0 }
0x1387   :  { %2080 = vmatpush3.bf16.msra.mxu0 %v2597_v4 }
0x1388   :  { %2121 = vmatprep.subr.bf16.mxu0 %v2479_v0 }
0x1455   :  { %v843_v1 = vpop.f32.mrb[24].mxu0 }
0x1456   :  { %v849_v3 = vadd.f32 %v843_v1, %v215_v63  ;;  %v2075_v5 = vpop.f32.mrb[25].mxu0 }
0x1457   :  { %v846_v8 = vpop.f32.mrb[26].mxu0 }
0x1458   :  { %2290 = vtanh.f32 %v849_v3  ;;  %v2076_v9 = vpop.f32.mrb[27].mxu0  ;;  %v1884_v2 = vmul.f32 -1.442695, %v849_v3 }
0x145a   :  { %2292 = vpow2.f32 %v1884_v2 }
0x1462   :  { %v2291_v11 = vpop.eup %2290 }
0x1463   :  { %859 = vrot.lane.b32.xlu0 %v2291_v11, %s2476_s13 }
0x1464   :  { %v2293_v12 = vpop.eup %2292 }
0x1465   :  { %v853_v13 = vadd.f32 1.0, %v2293_v12 }
0x1467   :  { %2294 = vrcp.f32 %v853_v13 }
0x1471   :  { %v2295_v4 = vpop.eup %2294 }
0x1472   :  { %v857_v20 = vmul.f32 %v2295_v4, %v787_v57 }
0x14d5   :  { %v860_v15 = vpop.permute.xlu0 %859 }
0x14d6   :  { %v862_v16 = vmul.f32 %v2295_v4, %v860_v15 }
0x14d8   :  { %864 = vrot.lane.b32.xlu1 %v862_v16, %s2482_s18 }
0x14dc   :  { %316 = vrot.lane.b32.xlu1 %v2629_v30, %s2482_s18  ;;  %v2227_v30 = vld [vmem:[%s3033_s4 + $0x18] sm:$0xff]  }
0x14dd   :  { %2092 = vmatpush3.bf16.msra.mxu1 %v2227_v30 }
0x14de   :  { %2093 = vmatprep.subr.bf16.mxu1 %v2479_v0 }
0x14e1   :  { %2094 = vmatpush3.bf16.msra.mxu1 %v2228_v19 }
0x14e2   :  { %2095 = vmatprep.subr.bf16.mxu1 %v2479_v0 }
0x14e5   :  { %2096 = vmatpush3.bf16.msra.mxu1 %v2229_v23 }
0x14e6   :  { %2097 = vmatprep.subr.bf16.mxu1 %v2479_v0 }
0x14e9   :  { %2098 = vmatpush3.bf16.msra.mxu1 %v2230_v25 }
0x14ea   :  { %2099 = vmatprep.subr.bf16.mxu1 %v2479_v0 }
0x14ed   :  { %2100 = vmatpush3.bf16.msra.mxu1 %v2231_v26 }
0x14ee   :  { %2177 = vmatprep.subr.bf16.mxu1 %v2479_v0 }
0x154a   :  { %v865_v21 = vpop.permute.xlu1 %864 }
0x154b   :  { %v2785_v22 = vadd.f32 %v865_v21, %v857_v20 }
0x154d   :  { %2296 = vtanh.f32 %v2785_v22 }
0x154e   :  { %v317_v24 = vpop.permute.xlu1 %316 }
0x154f   :  { %319 = vst.msk [vmem:[#allocation9] sm:$0xff] %vm137_vm1, %v317_v24 }
0x1556   :  { %v981_v33 = vld [vmem:[#allocation9] sm:$0xff] }
0x1557   :  { %v2297_v27 = vpop.eup %2296 }
0x1558   :  { %870 = vrot.lane.b32.xlu0 %v2297_v27, %s2476_s13 }
0x155c   :  { %395 = vrot.lane.b32.xlu0 %v2651_v52, %s2482_s18  ;;  %v2816_v52 = vld [vmem:[#allocation8 + $0x8] sm:$0xff]  }
0x15ca   :  { %v871_v28 = vpop.permute.xlu0 %870 }
0x15cb   :  { %v2804_v29 = vmul.f32 %v2295_v4, %v871_v28 }
0x15cd   :  { %v882_v31 = vpack.c.bf16 %v2804_v29, %v2804_v29 }
0x15ce   :  { %v396_v32 = vpop.permute.xlu0 %395 }
0x15cf   :  { %399 = vst.msk [vmem:[#allocation9 + $0x8] sm:$0xff] %vm137_vm1, %v396_v32  ;;  %884 = vrot.lane.b32.xlu1 %v882_v31, %s2482_s18 }
0x15d6   :  { %v982_v34 = vld [vmem:[#allocation9 + $0x8] sm:$0xff] }
0x15d7   :  { %v990_v35 = vpack.c.bf16 %v982_v34, %v981_v33 }
0x15d9   :  { %2102 = vmatmul.mubr.bf16.vlgmr.msra.gmra.mrb[24].mxu1 %v990_v35 }
0x15da   :  { %2105 = vmatprep.mubr.msk.bf16.mxu1 %vm2480_vm0, %v2479_v0  ;;  %2178 = vmatpush3.bf16.msra.mxu1 %v2810_v36 }
0x15db   :  { %2179 = vmatprep.subr.bf16.mxu1 %v2479_v0 }
0x15de   :  { %2180 = vmatpush3.bf16.msra.mxu1 %v2816_v52 }
0x15df   :  { %2185 = vmatprep.subr.bf16.mxu1 %v2479_v0 }
0x1641   :  { %v885_v38 = vpop.permute.xlu1 %884 }
0x1642   :  { %2082 = vmatmul.mubr.msk.bf16.vlgmr.msra.gmra.mrb[16].mxu0 %vm137_vm1, %v885_v38 }
0x1643   :  { %2122 = vmatpush3.bf16.msra.mxu0 %v2810_v36  ;;  %2125 = vmatprep.mubr.msk.bf16.mxu0 %vm2480_vm0, %v2479_v0 }
0x1644   :  { %2123 = vmatprep.subr.bf16.mxu0 %v2479_v0 }
0x1647   :  { %2124 = vmatpush3.bf16.msra.mxu0 %v2816_v52 }
0x1648   :  { %2129 = vmatprep.subr.bf16.mxu0 %v2479_v0 }
0x164a   :  { %2126 = vmatmul.mubr.bf16.vlgmr.msra.gmra.mrb[28].mxu0 %v2481_v6 }
0x164b   :  { %2130 = vmatpush3.bf16.msra.mxu0 %v2810_v36  ;;  %2133 = vmatprep.mubr.msk.bf16.mxu0 %vm2480_vm0, %v2479_v0 }
0x164c   :  { %2131 = vmatprep.subr.bf16.mxu0 %v2479_v0 }
0x164f   :  { %2132 = vmatpush3.bf16.msra.mxu0 %v2816_v52 }
0x1650   :  { %2137 = vmatprep.subr.bf16.mxu0 %v2479_v0 }
0x16ac   :  { %v1083_v39 = vpop.f32.mrb[24].mxu1 }
0x16ad   :  { %v2103_v40 = vpop.f32.mrb[25].mxu1  ;;  %v1084_v48 = vadd.f32 %v2839_v47, %v1083_v39 }
0x16ae   :  { %v1086_v42 = vpop.f32.mrb[26].mxu1 }
0x16af   :  { %v2104_v43 = vpop.f32.mrb[27].mxu1  ;;  %v1087_v12 = vadd.f32 %v2839_v47, %v1086_v42 }
0x1715   :  { %v2834_v44 = vpop.f32.mrb[16].mxu0 }
0x1716   :  { %v2083_v45 = vpop.f32.mrb[17].mxu0 }
0x1717   :  { %v926_v46 = vpop.f32.mrb[18].mxu0 }
0x1718   :  { %v2084_v6 = vpop.f32.mrb[19].mxu0 }
0x171d   :  { %v1177_v49 = vpop.f32.mrb[28].mxu0 }
0x171e   :  { %v1183_v50 = vadd.f32 %v1177_v49, %v1084_v48  ;;  %v2127_v51 = vpop.f32.mrb[29].mxu0 }
0x171f   :  { %v1180_v53 = vpop.f32.mrb[30].mxu0 }
0x1720   :  { %2298 = vtanh.f32 %v1183_v50  ;;  %v2128_v54 = vpop.f32.mrb[31].mxu0  ;;  %v1898_v56 = vmul.f32 -1.442695, %v1183_v50 }
0x1722   :  { %2300 = vpow2.f32 %v1898_v56 }
0x172a   :  { %v2299_v55 = vpop.eup %2298 }
0x172b   :  { %1193 = vrot.lane.b32.xlu0 %v2299_v55, %s2476_s13 }
0x172c   :  { %v2301_v57 = vpop.eup %2300 }
0x172d   :  { %v1187_v58 = vadd.f32 1.0, %v2301_v57 }
0x172f   :  { %2302 = vrcp.f32 %v1187_v58 }
0x1739   :  { %v2303_v59 = vpop.eup %2302 }
0x173a   :  { %v1191_v63 = vmul.f32 0.0, %v2303_v59 }
0x179d   :  { %v1194_v61 = vpop.permute.xlu0 %1193 }
0x179e   :  { %v1196_v62 = vmul.f32 %v2303_v59, %v1194_v61 }
0x17a0   :  { %1198 = vrot.lane.b32.xlu1 %v1196_v62, %s2482_s18 }
0x1812   :  { %v1199_v1 = vpop.permute.xlu1 %1198 }
0x1813   :  { %v1201_v3 = vadd.f32 %v1199_v1, %v1191_v63 }
0x1815   :  { %2304 = vtanh.f32 %v1201_v3 }
0x181f   :  { %v2305_v5 = vpop.eup %2304 }
0x1820   :  { %1204 = vrot.lane.b32.xlu0 %v2305_v5, %s2476_s13 }
0x1892   :  { %v1205_v8 = vpop.permute.xlu0 %1204 }
0x1893   :  { %v2845_v9 = vmul.f32 %v2303_v59, %v1205_v8 }
0x1895   :  { %v1214_v11 = vpack.c.bf16 %v2845_v9, %v2845_v9 }
0x1897   :  { %1216 = vrot.lane.b32.xlu1 %v1214_v11, %s2482_s18 }
0x1909   :  { %v1217_v2 = vpop.permute.xlu1 %1216 }
0x190a   :  { %2134 = vmatmul.mubr.msk.bf16.vlgmr.msra.gmra.mrb[32].mxu0 %vm137_vm1, %v1217_v2 }
0x190b   :  { %2138 = vmatpush3.bf16.msra.mxu0 %v2810_v36  ;;  %2141 = vmatprep.mubr.msk.bf16.mxu0 %vm2480_vm0, %v2479_v0 }
0x190c   :  { %2139 = vmatprep.subr.bf16.mxu0 %v2479_v0 }
0x190f   :  { %2140 = vmatpush3.bf16.msra.mxu0 %v2816_v52 }
0x1910   :  { %2145 = vmatprep.subr.bf16.mxu0 %v2479_v0 }
0x19dd   :  { %v1255_v13 = vpop.f32.mrb[32].mxu0 }
0x19de   :  { %v1261_v4 = vadd.f32 %v1255_v13, %v1087_v12  ;;  %v2135_v15 = vpop.f32.mrb[33].mxu0 }
0x19df   :  { %v1258_v16 = vpop.f32.mrb[34].mxu0 }
0x19e0   :  { %2306 = vtanh.f32 %v1261_v4  ;;  %v2136_v7 = vpop.f32.mrb[35].mxu0  ;;  %v1900_v17 = vmul.f32 -1.442695, %v1261_v4 }
0x19e2   :  { %2308 = vpow2.f32 %v1900_v17 }
0x19ea   :  { %v2307_v14 = vpop.eup %2306 }
0x19eb   :  { %1271 = vrot.lane.b32.xlu0 %v2307_v14, %s2476_s13 }
0x19ec   :  { %v2309_v30 = vpop.eup %2308 }
0x19ed   :  { %v1265_v19 = vadd.f32 1.0, %v2309_v30 }
0x19ef   :  { %2310 = vrcp.f32 %v1265_v19 }
0x19f9   :  { %v2311_v20 = vpop.eup %2310 }
0x19fa   :  { %v1269_v24 = vmul.f32 %v2311_v20, %v1201_v3 }
0x1a5d   :  { %v1272_v21 = vpop.permute.xlu0 %1271 }
0x1a5e   :  { %v1274_v23 = vmul.f32 %v2311_v20, %v1272_v21 }
0x1a60   :  { %1276 = vrot.lane.b32.xlu1 %v1274_v23, %s2482_s18 }
0x1a64   :  { %475 = vrot.lane.b32.xlu1 %v2667_v18, %s2482_s18 }
0x1ad2   :  { %v1277_v25 = vpop.permute.xlu1 %1276 }
0x1ad3   :  { %v1279_v26 = vadd.f32 %v1277_v25, %v1269_v24 }
0x1ad5   :  { %2312 = vtanh.f32 %v1279_v26 }
0x1ad6   :  { %v476_v27 = vpop.permute.xlu1 %475 }
0x1ad7   :  { %479 = vst.msk [vmem:[#allocation9 + $0x10] sm:$0xff] %vm137_vm1, %v476_v27 }
0x1ade   :  { %v983_v34 = vld [vmem:[#allocation9 + $0x10] sm:$0xff] }
0x1adf   :  { %v2313_v28 = vpop.eup %2312 }
0x1ae0   :  { %1282 = vrot.lane.b32.xlu0 %v2313_v28, %s2476_s13 }
0x1ae4   :  { %555 = vrot.lane.b32.xlu0 %v2689_v41, %s2482_s18  ;;  %v2878_v41 = vld [vmem:[#allocation9 + $0x20] sm:$0xff] }
0x1b52   :  { %v1283_v31 = vpop.permute.xlu0 %1282 }
0x1b53   :  { %v2866_v32 = vmul.f32 %v2311_v20, %v1283_v31 }
0x1b55   :  { %v1292_v33 = vpack.c.bf16 %v2866_v32, %v2866_v32 }
0x1b56   :  { %v556_v18 = vpop.permute.xlu0 %555 }
0x1b57   :  { %559 = vst.msk [vmem:[#allocation9 + $0x18] sm:$0xff] %vm137_vm1, %v556_v18  ;;  %1294 = vrot.lane.b32.xlu1 %v1292_v33, %s2482_s18 }
0x1b5e   :  { %v984_v35 = vld [vmem:[#allocation9 + $0x18] sm:$0xff] }
0x1b5f   :  { %v991_v38 = vpack.c.bf16 %v984_v35, %v983_v34 }
0x1b61   :  { %2106 = vmatmul.mubr.bf16.gmra.mrb[28].mxu1 %v991_v38 }
0x1b62   :  { %2109 = vmatprep.mubr.msk.bf16.mxu1 %vm2480_vm0, %v2479_v0 }
0x1bc9   :  { %v1295_v39 = vpop.permute.xlu1 %1294 }
0x1bca   :  { %2142 = vmatmul.mubr.msk.bf16.vlgmr.msra.gmra.mrb[36].mxu0 %vm137_vm1, %v1295_v39 }
0x1bcb   :  { %2146 = vmatpush3.bf16.msra.mxu0 %v2810_v36  ;;  %2149 = vmatprep.mubr.msk.bf16.mxu0 %vm2480_vm0, %v2479_v0 }
0x1bcc   :  { %2147 = vmatprep.subr.bf16.mxu0 %v2878_v41 }
0x1bcf   :  { %2148 = vmatpush3.bf16.msra.mxu0 %v2816_v52 }
0x1bd0   :  { %2153 = vmatprep.subr.bf16.mxu0 %v2878_v41 }
0x1c34   :  { %v1091_v40 = vpop.f32.mrb[28].mxu1 }
0x1c35   :  { %v2107_v42 = vpop.f32.mrb[29].mxu1  ;;  %v1092_v46 = vadd.f32 %v2839_v47, %v1091_v40 }
0x1c36   :  { %v1094_v43 = vpop.f32.mrb[30].mxu1 }
0x1c37   :  { %v2108_v45 = vpop.f32.mrb[31].mxu1  ;;  %v1095_v11 = vadd.f32 %v2839_v47, %v1094_v43 }
0x1c9d   :  { %v1333_v6 = vpop.f32.mrb[36].mxu0 }
0x1c9e   :  { %v1339_v48 = vadd.f32 %v1333_v6, %v1092_v46  ;;  %v2143_v49 = vpop.f32.mrb[37].mxu0 }
0x1c9f   :  { %v1336_v50 = vpop.f32.mrb[38].mxu0 }
0x1ca0   :  { %2314 = vtanh.f32 %v1339_v48  ;;  %v2144_v0 = vpop.f32.mrb[39].mxu0  ;;  %v1902_v53 = vmul.f32 -1.442695, %v1339_v48 }
0x1ca2   :  { %2316 = vpow2.f32 %v1902_v53 }
0x1caa   :  { %v2315_v51 = vpop.eup %2314 }
0x1cab   :  { %1349 = vrot.lane.b32.xlu0 %v2315_v51, %s2476_s13 }
0x1cac   :  { %v2317_v54 = vpop.eup %2316 }
0x1cad   :  { %v1343_v55 = vadd.f32 1.0, %v2317_v54 }
0x1caf   :  { %2318 = vrcp.f32 %v1343_v55 }
0x1cb9   :  { %v2319_v56 = vpop.eup %2318 }
0x1cba   :  { %v1347_v59 = vmul.f32 %v2319_v56, %v1279_v26 }
0x1d1d   :  { %v1350_v57 = vpop.permute.xlu0 %1349 }
0x1d1e   :  { %v1352_v58 = vmul.f32 %v2319_v56, %v1350_v57 }
0x1d20   :  { %1354 = vrot.lane.b32.xlu1 %v1352_v58, %s2482_s18 }
0x1d92   :  { %v1355_v61 = vpop.permute.xlu1 %1354 }
0x1d93   :  { %v1357_v62 = vadd.f32 %v1355_v61, %v1347_v59 }
0x1d95   :  { %2320 = vtanh.f32 %v1357_v62 }
0x1d9f   :  { %v2321_v63 = vpop.eup %2320 }
0x1da0   :  { %1360 = vrot.lane.b32.xlu0 %v2321_v63, %s2476_s13 }
0x1e12   :  { %v1361_v1 = vpop.permute.xlu0 %1360 }
0x1e13   :  { %v2887_v3 = vmul.f32 %v2319_v56, %v1361_v1 }
0x1e15   :  { %v1370_v5 = vpack.c.bf16 %v2887_v3, %v2887_v3 }
0x1e17   :  { %1372 = vrot.lane.b32.xlu1 %v1370_v5, %s2482_s18 }
0x1e89   :  { %v1373_v8 = vpop.permute.xlu1 %1372 }
0x1e8a   :  { %2150 = vmatmul.mubr.msk.bf16.vlgmr.msra.gmra.mrb[40].mxu0 %vm137_vm1, %v1373_v8 }
0x1e8b   :  { %2154 = vmatpush3.bf16.msra.mxu0 %v2810_v36  ;;  %2157 = vmatprep.mubr.msk.bf16.mxu0 %vm2480_vm0, %v2878_v41 }
0x1e8c   :  { %2155 = vmatprep.subr.bf16.mxu0 %v2878_v41 }
0x1e8f   :  { %2156 = vmatpush3.bf16.msra.mxu0 %v2816_v52 }
0x1e90   :  { %2161 = vmatprep.subr.bf16.mxu0 %v2878_v41 }
0x1f5d   :  { %v1411_v2 = vpop.f32.mrb[40].mxu0 }
0x1f5e   :  { %v1417_v12 = vadd.f32 %v1411_v2, %v1095_v11  ;;  %v2151_v13 = vpop.f32.mrb[41].mxu0 }
0x1f5f   :  { %v1414_v4 = vpop.f32.mrb[42].mxu0 }
0x1f60   :  { %2322 = vtanh.f32 %v1417_v12  ;;  %v2152_v15 = vpop.f32.mrb[43].mxu0  ;;  %v1904_v7 = vmul.f32 -1.442695, %v1417_v12 }
0x1f62   :  { %2324 = vpow2.f32 %v1904_v7 }
0x1f6a   :  { %v2323_v16 = vpop.eup %2322 }
0x1f6b   :  { %1427 = vrot.lane.b32.xlu0 %v2323_v16, %s2476_s13 }
0x1f6c   :  { %v2325_v14 = vpop.eup %2324 }
0x1f6d   :  { %v1421_v17 = vadd.f32 1.0, %v2325_v14 }
0x1f6f   :  { %2326 = vrcp.f32 %v1421_v17 }
0x1f79   :  { %v2327_v30 = vpop.eup %2326 }
0x1f7a   :  { %v1425_v21 = vmul.f32 %v2327_v30, %v1357_v62 }
0x1fdd   :  { %v1428_v19 = vpop.permute.xlu0 %1427 }
0x1fde   :  { %v1430_v20 = vmul.f32 %v2327_v30, %v1428_v19 }
0x1fe0   :  { %1432 = vrot.lane.b32.xlu1 %v1430_v20, %s2482_s18 }
0x1fe4   :  { %635 = vrot.lane.b32.xlu1 %v2717_v10, %s2482_s18 }
0x2052   :  { %v1433_v23 = vpop.permute.xlu1 %1432 }
0x2053   :  { %v1435_v24 = vadd.f32 %v1433_v23, %v1425_v21 }
0x2055   :  { %2328 = vtanh.f32 %v1435_v24 }
0x2056   :  { %v636_v25 = vpop.permute.xlu1 %635 }
0x2057   :  { %639 = vst.msk [vmem:[#allocation9 + $0x20] sm:$0xff] %vm137_vm1, %v636_v25 }
0x205e   :  { %v985_v33 = vld [vmem:[#allocation9 + $0x20] sm:$0xff] }
0x205f   :  { %v2329_v26 = vpop.eup %2328 }
0x2060   :  { %1438 = vrot.lane.b32.xlu0 %v2329_v26, %s2476_s13 }
0x2064   :  { %715 = vrot.lane.b32.xlu0 %v2735_v37, %s2482_s18 }
0x20d2   :  { %v1439_v27 = vpop.permute.xlu0 %1438 }
0x20d3   :  { %v2908_v28 = vmul.f32 %v2327_v30, %v1439_v27 }
0x20d5   :  { %v1448_v31 = vpack.c.bf16 %v2908_v28, %v2908_v28 }
0x20d6   :  { %v716_v10 = vpop.permute.xlu0 %715 }
0x20d7   :  { %719 = vst.msk [vmem:[#allocation9 + $0x28] sm:$0xff] %vm137_vm1, %v716_v10  ;;  %1450 = vrot.lane.b32.xlu1 %v1448_v31, %s2482_s18 }
0x20de   :  { %v986_v18 = vld [vmem:[#allocation9 + $0x28] sm:$0xff] }
0x20df   :  { %v992_v34 = vpack.c.bf16 %v986_v18, %v985_v33 }
0x20e1   :  { %2110 = vmatmul.mubr.bf16.gmra.mrb[32].mxu1 %v992_v34 }
0x20e2   :  { %2113 = vmatprep.mubr.msk.bf16.mxu1 %vm2480_vm0, %v2878_v41 }
0x2149   :  { %v1451_v35 = vpop.permute.xlu1 %1450 }
0x214a   :  { %2158 = vmatmul.mubr.msk.bf16.vlgmr.msra.gmra.mrb[44].mxu0 %vm137_vm1, %v1451_v35 }
0x214b   :  { %2162 = vmatpush3.bf16.msra.mxu0 %v2810_v36  ;;  %2165 = vmatprep.mubr.msk.bf16.mxu0 %vm2480_vm0, %v2878_v41 }
0x214c   :  { %2163 = vmatprep.subr.bf16.mxu0 %v2878_v41 }
0x214f   :  { %2164 = vmatpush3.bf16.msra.mxu0 %v2816_v52 }
0x2150   :  { %2169 = vmatprep.subr.bf16.mxu0 %v2878_v41 }
0x21b4   :  { %v1099_v37 = vpop.f32.mrb[32].mxu1 }
0x21b5   :  { %v2111_v38 = vpop.f32.mrb[33].mxu1  ;;  %v1100_v42 = vadd.f32 %v2839_v47, %v1099_v37 }
0x21b6   :  { %v1102_v39 = vpop.f32.mrb[34].mxu1 }
0x21b7   :  { %v2112_v40 = vpop.f32.mrb[35].mxu1  ;;  %v1103_v5 = vadd.f32 %v2839_v47, %v1102_v39 }
0x221d   :  { %v1489_v43 = vpop.f32.mrb[44].mxu0 }
0x221e   :  { %v1495_v45 = vadd.f32 %v1489_v43, %v1100_v42  ;;  %v2159_v46 = vpop.f32.mrb[45].mxu0 }
0x221f   :  { %v1492_v6 = vpop.f32.mrb[46].mxu0 }
0x2220   :  { %2330 = vtanh.f32 %v1495_v45  ;;  %v2160_v48 = vpop.f32.mrb[47].mxu0  ;;  %v1906_v50 = vmul.f32 -1.442695, %v1495_v45 }
0x2222   :  { %2332 = vpow2.f32 %v1906_v50 }
0x222a   :  { %v2331_v49 = vpop.eup %2330 }
0x222b   :  { %1505 = vrot.lane.b32.xlu0 %v2331_v49, %s2476_s13 }
0x222c   :  { %v2333_v0 = vpop.eup %2332 }
0x222d   :  { %v1499_v51 = vadd.f32 1.0, %v2333_v0 }
0x222f   :  { %2334 = vrcp.f32 %v1499_v51 }
0x2239   :  { %v2335_v53 = vpop.eup %2334 }
0x223a   :  { %v1503_v56 = vmul.f32 %v2335_v53, %v1435_v24  ;;  %v2379_v24 = vld [vmem:[%s3032_s3] ss:$0 sm:$0xff]  ;;  %s2483_s3 = smov [#allocation9]  }
0x223b   :  { %v2193_v25 = vadd.f32 %v2379_v24, %v2834_v44 }
0x223d   :  { %v1886_v27 = vmul.f32 -1.442695, %v2193_v25 }
0x229d   :  { %v1506_v54 = vpop.permute.xlu0 %1505 }
0x229e   :  { %v1508_v55 = vmul.f32 %v2335_v53, %v1506_v54 }
0x22a0   :  { %1510 = vrot.lane.b32.xlu1 %v1508_v55, %s2482_s18 }
0x2312   :  { %v1511_v57 = vpop.permute.xlu1 %1510 }
0x2313   :  { %v1513_v58 = vadd.f32 %v1511_v57, %v1503_v56 }
0x2315   :  { %2336 = vtanh.f32 %v1513_v58 }
0x231f   :  { %v2337_v59 = vpop.eup %2336 }
0x2320   :  { %1516 = vrot.lane.b32.xlu0 %v2337_v59, %s2476_s13 }
0x2392   :  { %v1517_v61 = vpop.permute.xlu0 %1516 }
0x2393   :  { %v2927_v62 = vmul.f32 %v2335_v53, %v1517_v61 }
0x2395   :  { %v1526_v63 = vpack.c.bf16 %v2927_v62, %v2927_v62 }
0x2397   :  { %1528 = vrot.lane.b32.xlu1 %v1526_v63, %s2482_s18 }
0x2409   :  { %v1529_v1 = vpop.permute.xlu1 %1528 }
0x240a   :  { %2166 = vmatmul.mubr.msk.bf16.vlgmr.msra.gmra.mrb[48].mxu0 %vm137_vm1, %v1529_v1 }
0x240b   :  { %2170 = vmatpush3.bf16.msra.mxu0 %v2810_v36  ;;  %2173 = vmatprep.mubr.msk.bf16.mxu0 %vm2480_vm0, %v2878_v41 }
0x240c   :  { %2171 = vmatprep.subr.bf16.mxu0 %v2878_v41 }
0x240f   :  { %2172 = vmatpush3.bf16.msra.mxu0 %v2816_v52 }
0x24dd   :  { %v1567_v8 = vpop.f32.mrb[48].mxu0 }
0x24de   :  { %v1573_v11 = vadd.f32 %v1567_v8, %v1103_v5  ;;  %v2167_v2 = vpop.f32.mrb[49].mxu0 }
0x24df   :  { %v1570_v12 = vpop.f32.mrb[50].mxu0 }
0x24e0   :  { %2338 = vtanh.f32 %v1573_v11  ;;  %v2168_v13 = vpop.f32.mrb[51].mxu0  ;;  %v1908_v15 = vmul.f32 -1.442695, %v1573_v11 }
0x24e2   :  { %2340 = vpow2.f32 %v1908_v15 }
0x24ea   :  { %v2339_v4 = vpop.eup %2338 }
0x24eb   :  { %1583 = vrot.lane.b32.xlu0 %v2339_v4, %s2476_s13 }
0x24ec   :  { %v2341_v16 = vpop.eup %2340 }
0x24ed   :  { %v1577_v7 = vadd.f32 1.0, %v2341_v16 }
0x24ef   :  { %2342 = vrcp.f32 %v1577_v7 }
0x24f9   :  { %v2343_v14 = vpop.eup %2342 }
0x24fa   :  { %v1581_v19 = vmul.f32 %v2343_v14, %v1513_v58 }
0x255d   :  { %v1584_v17 = vpop.permute.xlu0 %1583 }
0x255e   :  { %v1586_v30 = vmul.f32 %v2343_v14, %v1584_v17 }
0x2560   :  { %1588 = vrot.lane.b32.xlu1 %v1586_v30, %s2482_s18 }
0x2564   :  { %795 = vrot.lane.b32.xlu1 %v2747_v60, %s2482_s18 }
0x25d2   :  { %v1589_v20 = vpop.permute.xlu1 %1588 }
0x25d3   :  { %v2943_v21 = vadd.f32 %v1589_v20, %v1581_v19 }
0x25d5   :  { %2344 = vtanh.f32 %v2943_v21 }
0x25d6   :  { %v796_v23 = vpop.permute.xlu1 %795  ;;  %2346 = vtanh.f32 %v2193_v25 }
0x25d7   :  { %799 = vst.msk [vmem:[#allocation9 + $0x30] sm:$0xff] %vm137_vm1, %v796_v23  ;;  %2348 = vpow2.f32 %v1886_v27 }
0x25de   :  { %v987_v38 = vld [vmem:[#allocation9 + $0x30] sm:$0xff] }
0x25df   :  { %v2345_v26 = vpop.eup %2344 }
0x25e0   :  { %1594 = vrot.lane.b32.xlu0 %v2345_v26, %s2476_s13  ;;  %v2347_v60 = vpop.eup %2346 }
0x25e1   :  { %v2349_v31 = vpop.eup %2348 }
0x25e2   :  { %v933_v10 = vadd.f32 1.0, %v2349_v31 }
0x25e4   :  { %875 = vrot.lane.b32.xlu0 %v2804_v29, %s2482_s18  ;;  %2350 = vrcp.f32 %v933_v10 }
0x25e8   :  { %939 = vrot.lane.b32.xlu0 %v2347_v60, %s2476_s13 }
0x25ee   :  { %v2351_v29 = vpop.eup %2350 }
0x25ef   :  { %v937_v43 = vmul.f32 %v2351_v29, %v2785_v22 }
0x2652   :  { %v1595_v33 = vpop.permute.xlu0 %1594 }
0x2653   :  { %v2955_v18 = vmul.f32 %v2343_v14, %v1595_v33 }
0x2655   :  { %v1604_v44 = vpack.c.bf16 %v2955_v18, %v2955_v18 }
0x2656   :  { %v876_v34 = vpop.permute.xlu0 %875 }
0x2657   :  { %879 = vst.msk [vmem:[#allocation9 + $0x38] sm:$0xff] %vm137_vm1, %v876_v34  ;;  %1606 = vrot.lane.b32.xlu1 %v1604_v44, %s2482_s18 }
0x265a   :  { %v940_v35 = vpop.permute.xlu0 %939 }
0x265b   :  { %v942_v37 = vmul.f32 %v2351_v29, %v940_v35 }
0x265d   :  { %944 = vrot.lane.b32.xlu0 %v942_v37, %s2482_s18 }
0x265e   :  { %v988_v39 = vld [vmem:[#allocation9 + $0x38] sm:$0xff] }
0x265f   :  { %v993_v40 = vpack.c.bf16 %v988_v39, %v987_v38 }
0x2661   :  { %2114 = vmatmul.mubr.bf16.gmra.mrb[36].mxu1 %v993_v40 }
0x2662   :  { %2117 = vmatprep.mubr.msk.bf16.mxu1 %vm2480_vm0, %v2878_v41 }
0x26c9   :  { %v1607_v42 = vpop.permute.xlu1 %1606 }
0x26ca   :  { %2174 = vmatmul.mubr.msk.bf16.vlgmr.msra.gmra.mrb[52].mxu0 %vm137_vm1, %v1607_v42 }
0x26cf   :  { %v945_v45 = vpop.permute.xlu0 %944 }
0x26d0   :  { %v947_v46 = vadd.f32 %v945_v45, %v937_v43 }
0x26d2   :  { %2352 = vtanh.f32 %v947_v46 }
0x26dc   :  { %v2353_v6 = vpop.eup %2352 }
0x26dd   :  { %950 = vrot.lane.b32.xlu0 %v2353_v6, %s2476_s13 }
0x2734   :  { %v1107_v48 = vpop.f32.mrb[36].mxu1 }
0x2735   :  { %v2115_v49 = vpop.f32.mrb[37].mxu1  ;;  %v1108_v54 = vadd.f32 %v2839_v47, %v1107_v48 }
0x2736   :  { %v1110_v50 = vpop.f32.mrb[38].mxu1 }
0x2737   :  { %v2116_v0 = vpop.f32.mrb[39].mxu1  ;;  %v1111_v20 = vadd.f32 %v2839_v47, %v1110_v50 }
0x274f   :  { %v951_v51 = vpop.permute.xlu0 %950 }
0x2750   :  { %v953_v53 = vmul.f32 %v2351_v29, %v951_v51 }
0x2752   :  { %955 = vrot.lane.b32.xlu0 %v953_v53, %s2482_s18 }
0x279d   :  { %v1645_v55 = vpop.f32.mrb[52].mxu0 }
0x279e   :  { %v1651_v56 = vadd.f32 %v1645_v55, %v1108_v54  ;;  %v2175_v57 = vpop.f32.mrb[53].mxu0 }
0x279f   :  { %v1648_v22 = vpop.f32.mrb[54].mxu0 }
0x27a0   :  { %2354 = vtanh.f32 %v1651_v56  ;;  %v2176_v58 = vpop.f32.mrb[55].mxu0  ;;  %v1910_v5 = vmul.f32 -1.442695, %v1651_v56 }
0x27a2   :  { %2356 = vpow2.f32 %v1910_v5 }
0x27aa   :  { %v2355_v59 = vpop.eup %2354 }
0x27ab   :  { %1661 = vrot.lane.b32.xlu1 %v2355_v59, %s2476_s13 }
0x27ac   :  { %v2357_v8 = vpop.eup %2356 }
0x27ad   :  { %v1655_v11 = vadd.f32 1.0, %v2357_v8 }
0x27af   :  { %2358 = vrcp.f32 %v1655_v11 }
0x27b9   :  { %v2359_v2 = vpop.eup %2358 }
0x27ba   :  { %v1659_v4 = vmul.f32 %v2359_v2, %v2943_v21 }
0x27c4   :  { %v956_v61 = vpop.permute.xlu0 %955 }
0x27c5   :  { %959 = vst.msk [vmem:[#allocation9 + $0x40] sm:$0xff] %vm137_vm1, %v956_v61 }
0x27cc   :  { %v989_v63 = vld [vmem:[#allocation9 + $0x40] sm:$0xff] }
0x27cd   :  { %v994_v1 = vpack.c.bf16 %v989_v63, %v989_v63 }
0x27cf   :  { %2118 = vmatmul.mubr.bf16.gmra.mrb[40].mxu1 %v994_v1 }
0x27d0   :  { %2181 = vmatprep.mubr.msk.bf16.mxu1 %vm2480_vm0, %v2878_v41 }
0x281d   :  { %v1662_v12 = vpop.permute.xlu1 %1661 }
0x281e   :  { %v1664_v13 = vmul.f32 %v2359_v2, %v1662_v12 }
0x2820   :  { %1666 = vrot.lane.b32.xlu1 %v1664_v13, %s2482_s18 }
0x2892   :  { %v1667_v15 = vpop.permute.xlu1 %1666 }
0x2893   :  { %v1669_v16 = vadd.f32 %v1667_v15, %v1659_v4 }
0x2895   :  { %2360 = vtanh.f32 %v1669_v16 }
0x289f   :  { %v2361_v7 = vpop.eup %2360 }
0x28a0   :  { %1672 = vrot.lane.b32.xlu1 %v2361_v7, %s2476_s13 }
0x2912   :  { %v1673_v14 = vpop.permute.xlu1 %1672 }
0x2913   :  { %v1675_v17 = vmul.f32 %v2359_v2, %v1673_v14 }
0x2915   :  { %v1682_v30 = vpack.c.bf16 %v1675_v17, %v1675_v17 }
0x2917   :  { %1684 = vrot.lane.b32.xlu1 %v1682_v30, %s2482_s18 }
0x2989   :  { %v1685_v19 = vpop.permute.xlu1 %1684 }
0x298a   :  { %2182 = vmatmul.mubr.msk.bf16.vlgmr.msra.gmra.mrb[44].mxu1 %vm137_vm1, %v1685_v19 }
0x298b   :  { %2186 = vmatpush3.bf16.msra.mxu1 %v2810_v36  ;;  %2189 = vmatprep.mubr.msk.bf16.mxu1 %vm2480_vm0, %v2878_v41 }
0x298c   :  { %2187 = vmatprep.subr.bf16.mxu1 %v2878_v41 }
0x298f   :  { %2188 = vmatpush3.bf16.msra.mxu1 %v2816_v52 }
0x2a5d   :  { %v1723_v21 = vpop.f32.mrb[44].mxu1 }
0x2a5e   :  { %v1729_v23 = vadd.f32 %v1723_v21, %v1111_v20  ;;  %v2183_v24 = vpop.f32.mrb[45].mxu1 }
0x2a5f   :  { %v1726_v25 = vpop.f32.mrb[46].mxu1 }
0x2a60   :  { %2362 = vtanh.f32 %v1729_v23  ;;  %v2184_v26 = vpop.f32.mrb[47].mxu1  ;;  %v1912_v27 = vmul.f32 -1.442695, %v1729_v23 }
0x2a62   :  { %2364 = vpow2.f32 %v1912_v27 }
0x2a6a   :  { %v2363_v60 = vpop.eup %2362 }
0x2a6b   :  { %1739 = vrot.lane.b32.xlu0 %v2363_v60, %s2476_s13 }
0x2a6c   :  { %v2365_v36 = vpop.eup %2364 }
0x2a6d   :  { %v1733_v31 = vadd.f32 1.0, %v2365_v36 }
0x2a6f   :  { %2366 = vrcp.f32 %v1733_v31 }
0x2a79   :  { %v2367_v10 = vpop.eup %2366 }
0x2a7a   :  { %v1737_v52 = vmul.f32 %v2367_v10, %v1669_v16 }
0x2add   :  { %v1740_v41 = vpop.permute.xlu0 %1739 }
0x2ade   :  { %v1742_v33 = vmul.f32 %v2367_v10, %v1740_v41 }
0x2ae0   :  { %1744 = vrot.lane.b32.xlu1 %v1742_v33, %s2482_s18 }
0x2b52   :  { %v1745_v44 = vpop.permute.xlu1 %1744 }
0x2b53   :  { %v1747_v34 = vadd.f32 %v1745_v44, %v1737_v52 }
0x2b55   :  { %2368 = vtanh.f32 %v1747_v34 }
0x2b5f   :  { %v2369_v29 = vpop.eup %2368 }
0x2b60   :  { %1750 = vrot.lane.b32.xlu0 %v2369_v29, %s2476_s13 }
0x2bd2   :  { %v1751_v35 = vpop.permute.xlu0 %1750 }
0x2bd3   :  { %v1753_v37 = vmul.f32 %v2367_v10, %v1751_v35 }
0x2bd5   :  { %v1760_v38 = vpack.c.bf16 %v1753_v37, %v1753_v37 }
0x2bd7   :  { %1762 = vrot.lane.b32.xlu1 %v1760_v38, %s2482_s18 }
0x2c49   :  { %v1763_v39 = vpop.permute.xlu1 %1762 }
0x2c4a   :  { %2190 = vmatmul.mubr.msk.bf16.vlgmr.msra.gmra.mrb[40].mxu1 %vm137_vm1, %v1763_v39 }
0x2d1d   :  { %v1801_v40 = vpop.f32.mrb[40].mxu1 }
0x2d1e   :  { %v2194_v42 = vadd.f32 %v2839_v47, %v1801_v40  ;;  %v2191_v43 = vpop.f32.mrb[41].mxu1 }
0x2d1f   :  { %v1804_v45 = vpop.f32.mrb[42].mxu1 }
0x2d20   :  { %2370 = vtanh.f32 %v2194_v42  ;;  %v2192_v46 = vpop.f32.mrb[43].mxu1  ;;  %v1914_v48 = vmul.f32 -1.442695, %v2194_v42 }
0x2d22   :  { %2372 = vpow2.f32 %v1914_v48 }
0x2d2a   :  { %v2371_v6 = vpop.eup %2370 }
0x2d2b   :  { %1817 = vrot.lane.b32.xlu0 %v2371_v6, %s2476_s13 }
0x2d2c   :  { %v2373_v49 = vpop.eup %2372 }
0x2d2d   :  { %v1811_v50 = vadd.f32 1.0, %v2373_v49 }
0x2d2f   :  { %2374 = vrcp.f32 %v1811_v50 }
0x2d39   :  { %v2375_v0 = vpop.eup %2374 }
0x2d3a   :  { %v1815_v47 = vmul.f32 %v2375_v0, %v1747_v34 }
0x2d9d   :  { %v1818_v51 = vpop.permute.xlu0 %1817 }
0x2d9e   :  { %v1820_v53 = vmul.f32 %v2375_v0, %v1818_v51 }
0x2da0   :  { %1822 = vrot.lane.b32.xlu1 %v1820_v53, %s2482_s18 }
0x2da4   :  { %1209 = vrot.lane.b32.xlu1 %v2845_v9, %s2482_s18 }
0x2da8   :  { %1365 = vrot.lane.b32.xlu1 %v2887_v3, %s2482_s18 }
0x2dac   :  { %1521 = vrot.lane.b32.xlu1 %v2927_v62, %s2482_s18 }
0x2db0   :  { %1677 = vrot.lane.b32.xlu1 %v1675_v17, %s2482_s18 }
0x2e12   :  { %v1823_v54 = vpop.permute.xlu1 %1822 }
0x2e13   :  { %v1825_v55 = vadd.f32 %v1823_v54, %v1815_v47 }
0x2e15   :  { %2376 = vtanh.f32 %v1825_v55 }
0x2e16   :  { %v1210_v56 = vpop.permute.xlu1 %1209 }
0x2e17   :  { %1212 = vst.msk [vmem:[#allocation9] sm:$0xff] %vm137_vm1, %v1210_v56 }
0x2e1a   :  { %v1366_v57 = vpop.permute.xlu1 %1365 }
0x2e1b   :  { %1368 = vst.msk [vmem:[#allocation9 + $0x10] sm:$0xff] %vm137_vm1, %v1366_v57 }
0x2e1e   :  { %v1522_v22 = vpop.permute.xlu1 %1521 }
0x2e1f   :  { %v2377_v9 = vpop.eup %2376  ;;  %1524 = vst.msk [vmem:[#allocation9 + $0x20] sm:$0xff] %vm137_vm1, %v1522_v22 }
0x2e20   :  { %1828 = vrot.lane.b32.xlu0 %v2377_v9, %s2476_s13  ;;  %s1842_s13 = sshll.u32 %s2483_s3, 4  ;;  %s1843_s13 = int_to_ptr.vmem [resolvable:$true] %s1842_s13 }
0x2e21   :  { %s2446_s20 = scalar_lea.vmem %s1843_s13, 1152  ;;  %p2451_p11 = scmp.lt.s32.totalorder %s1843_s13, %s1843_s13 }
0x2e22   :  { %v1678_v3 = vpop.permute.xlu1 %1677  ;;  %p2447_p10 = scmp.ne.s32.totalorder %s1843_s13, %s2446_s20  ;;  %p2452_p12 = scmp.lt.s32.totalorder %s2446_s20, %s2446_s20 }
0x2e23   :  { %1680 = vst.msk [vmem:[#allocation9 + $0x30] sm:$0xff] %vm137_vm1, %v1678_v3 }
0x2e24   :  { %1287 = vrot.lane.b32.xlu0 %v2866_v32, %s2482_s18  ;;  %p2453_p13 = por %p2452_p12, %p2451_p11 }
0x2e26   :  { %p2454_p0 = pnand %p2453_p13, %p2447_p10 }
0x2e28   :  { %1443 = vrot.lane.b32.xlu0 %v2908_v28, %s2482_s18 }
0x2e2c   :  { %1599 = vrot.lane.b32.xlu0 %v2955_v18, %s2482_s18 }
0x2e30   :  { %1755 = vrot.lane.b32.xlu0 %v1753_v37, %s2482_s18 }
0x2e92   :  { %v1829_v62 = vpop.permute.xlu0 %1828 }
0x2e93   :  { %v1831_v58 = vmul.f32 %v2375_v0, %v1829_v62 }
0x2e95   :  { %1833 = vrot.lane.b32.xlu1 %v1831_v58, %s2482_s18 }
0x2e96   :  { %v1288_v59 = vpop.permute.xlu0 %1287 }
0x2e97   :  { %1290 = vst.msk [vmem:[#allocation9 + $0x8] sm:$0xff] %vm137_vm1, %v1288_v59 }
0x2e9a   :  { %v1444_v61 = vpop.permute.xlu0 %1443 }
0x2e9b   :  { %1446 = vst.msk [vmem:[#allocation9 + $0x18] sm:$0xff] %vm137_vm1, %v1444_v61 }
0x2e9e   :  { %v1600_v63 = vpop.permute.xlu0 %1599 }
0x2e9f   :  { %1602 = vst.msk [vmem:[#allocation9 + $0x28] sm:$0xff] %vm137_vm1, %v1600_v63 }
0x2ea2   :  { %v1756_v32 = vpop.permute.xlu0 %1755 }
0x2ea3   :  { %1758 = vst.msk [vmem:[#allocation9 + $0x38] sm:$0xff] %vm137_vm1, %v1756_v32 }
0x2f07   :  { %v1834_v28 = vpop.permute.xlu1 %1833 }
0x2f08   :  { %1836 = vst.msk [vmem:[#allocation9 + $0x40] sm:$0xff] %vm137_vm1, %v1834_v28 }
0x2f09   :  { %2457 = shalt.err (!%p2454_p0)
}
0x2f0a   :  { %s2458_s22 = scalar_lea.hbm %s3036_s7, 1152 }
0x2f0b   :  { %p2459_p1 = scmp.ne.s32.totalorder %s3036_s7, %s2458_s22  ;;  %p2462_p2 = scmp.lt.u32.totalorder %s2458_s22, %s3036_s7 }
0x2f0d   :  { %p2464_p3 = pnand %p2462_p2, %p2459_p1 }
0x2f0f   :  { %2467 = shalt.err (!%p2464_p3)
}
0x2f10   :  { %s2484_s0 = smov 128   ;;  %s2485_s26 = smov 8  }
0x2f11   :  { %1848 = dma.vmem_to_hbm [thread:$0]  %s1843_s13, 1152, %s3036_s7, [#allocation5], %s2484_s0, %s2484_s0, %s2485_s26  }
0x2f12   :  { %2472 = dma.done.wait [#allocation5], 1152  }
0x2f13   :  { %2473 = vsyncadd [#allocation5], 4294966144 }
0x2f14   :  { %1852 = vsyncpa [#allocation4], 1 }
0x2f15   :  { %1853 = vsyncpa [#allocation7], 1 }
0x2f16   :  { %1854 = vsyncpa [#allocation5], 1 }

</bundles_post_ra>
